<compile_context>
chip_gen: v7x
topology: tpu7x:2x2x1
jax: 0.10.0
libtpu: 0.0.40
codegen_flags: <defaults>
</compile_context>

<pallas_src>
import functools

import jax
import jax.numpy as jnp
from jax import lax
from jax.experimental import pallas as pl
from jax.experimental.pallas import tpu as pltpu


# tap order k = (dh+1)*3 + (dw+1), matching the (Cout, kh, kw, Cin) weight reshape.
_TAPS = tuple((dh, dw) for dh in (-1, 0, 1) for dw in (-1, 0, 1))


def _build_masks(H, W, dils=(1, 2, 4)):
    """(len(dils)*9, H*W) f32: 1.0 where tap (dh*d, dw*d) is inside the image."""
    HW = H * W
    pos = jnp.arange(HW, dtype=jnp.int32)
    h = pos // W
    w = pos - h * W
    rows = []
    for d in dils:
        for dh, dw in _TAPS:
            hh = h + dh * d
            ww = w + dw * d
            ok = (hh >= 0) & (hh < H) & (ww >= 0) & (ww < W)
            rows.append(ok.astype(jnp.float32))
    return jnp.stack(rows, axis=0)


def _conv3x3_flat(act, w_bf16, masks_ref, mrow0, d, H, W):
    """3x3 'same' conv (dilation d) on a (Cin, H*W) f32 activation.

    9 lane rolls of the flat HW axis (border taps zeroed by mask rows loaded from
    `masks_ref` starting at row `mrow0`) are concatenated into a (9*Cin, HW) slab,
    cast to bf16 once, and contracted with w_bf16 (Cout, 9*Cin) in one MXU matmul
    with f32 accumulation.  Returns (Cout, HW) f32.
    """
    HW = H * W
    parts = []
    for k, (dh, dw) in enumerate(_TAPS):
        delta = d * (dh * W + dw)            # flat-index offset of this tap
        if delta == 0:
            parts.append(act)                # center tap: always in-bounds
        else:
            # shifted[:, o] = act[:, o + delta]; wrapped garbage is masked out.
            shifted = pltpu.roll(act, shift=(-delta) % HW, axis=1)
            m = masks_ref[mrow0 + k:mrow0 + k + 1, :]       # (1, HW) f32 load
            parts.append(shifted * m)
    slab = jnp.concatenate(parts, axis=0).astype(jnp.bfloat16)   # (9*Cin, HW)
    return jnp.dot(w_bf16, slab, preferred_element_type=jnp.float32)


def _dscm_kernel(x_ref, wconv_ref, w1x1_ref, vecs_ref, masks_ref, gamma_ref,
                 o_ref, *, C, H, W):
    x = x_ref[0]                                             # (C, HW) f32

    # ---- consolidated weights (bf16, sliced straight off the refs) ----------
    w3r1 = wconv_ref[0 * C:1 * C, :]     # conv3x3.weight * bn[0] scale
    w3r2 = wconv_ref[1 * C:2 * C, :]     # conv3x3.weight * bn[1] scale
    w3r3 = wconv_ref[2 * C:3 * C, :]     # conv3x3.weight * bn[2] scale
    w331 = wconv_ref[3 * C:4 * C, :]     # conv3x3_1[0] (out ch zero-padded to C)
    w332 = wconv_ref[4 * C:5 * C, :]     # conv3x3_2[0] (in/out ch zero-padded)

    wd = w1x1_ref[0 * C:1 * C, :]        # dconv1        (C, 2C)
    wl = w1x1_ref[1 * C:2 * C, 0:C]      # conv_last * BN scale (C, C)
    wcg = w1x1_ref[2 * C:3 * C + 1, :]   # conv1x1[0] rows + conv1 (gate) row

    # ---- consolidated bias / BN-shift columns (f32) -------------------------
    vecs = vecs_ref[...]                                     # (C+1, 8)
    t1 = vecs[:C, 0:1]
    t2 = vecs[:C, 1:2]
    t3 = vecs[:C, 2:3]
    bd = vecs[:C, 3:4]
    bcg = vecs[:, 4:5]                                       # (C+1, 1): bc ++ w1b
    b331 = vecs[:C, 5:6]
    b332 = vecs[:C, 6:7]
    tl = vecs[:C, 7:8]

    # ---- three dilated branches (shared weight, BN scale pre-folded) --------
    br1 = _conv3x3_flat(x, w3r1, masks_ref, 0, 1, H, W) + t1
    br2 = _conv3x3_flat(x, w3r2, masks_ref, 9, 2, H, W) + t2
    br3 = _conv3x3_flat(x, w3r3, masks_ref, 18, 4, H, W) + t3

    def attention(a, bb):
        feat = jnp.concatenate([a, bb], axis=0)              # (2C, HW) f32
        feat_bf = feat.astype(jnp.bfloat16)
        # one MXU dot gives both conv1x1[0] (rows 0..C-1) and conv1 gate (row C)
        z = jnp.dot(wcg, feat_bf, preferred_element_type=jnp.float32) + bcg
        z = jnp.maximum(z, 0.0)                               # relu on both paths
        f = z[:C, :]
        g = z[C:C + 1, :]
        g = pl.reciprocal(1.0 + jnp.exp(-g), approx=True)     # sigmoid via EUP rcp
        # dconv1 (2C -> C) on gated features
        out = jnp.dot(wd, (feat * g).astype(jnp.bfloat16),
                      preferred_element_type=jnp.float32) + bd
        # conv3x3_1[0] (C -> C//2, zero-padded out channels) + relu
        f2 = jnp.maximum(_conv3x3_flat(f, w331, masks_ref, 0, 1, H, W) + b331, 0.0)
        # conv3x3_2[0] (C//2 -> 2, padded) + softmax over the 2 real channels
        att = _conv3x3_flat(f2, w332, masks_ref, 0, 1, H, W) + b332
        a0 = att[0:1, :]
        a1 = att[1:2, :]
        m = jnp.maximum(a0, a1)
        e0 = jnp.exp(a0 - m)
        e1 = jnp.exp(a1 - m)
        inv = pl.reciprocal(e0 + e1, approx=True)
        return out, e0 * inv, e1 * inv

    out1, a10, a11 = attention(br1, br2)
    fusion = a10 * br1 + a11 * br2 + out1

    out2, a20, a21 = attention(fusion, br3)
    pre = a20 * fusion + a21 * br3 + out2

    gm = gamma_ref[0]                                        # scalar from SMEM
    ax = jnp.maximum(gm * pre + (1.0 - gm) * x, 0.0)

    # conv_last: 1x1 conv (BN scale folded into wl) + shift + relu
    y = jnp.dot(wl, ax.astype(jnp.bfloat16), preferred_element_type=jnp.float32)
    o_ref[0] = jnp.maximum(y + tl, 0.0).astype(o_ref.dtype)


# --------------------------------- wrapper ----------------------------------

def dscm_forward(x, p):
    """x: (B, C, H, W) float32 (NCHW, like the PyTorch module)."""
    B, C, H, W = x.shape
    HW = H * W
    xf = x.reshape(B, C, HW)
    kern = functools.partial(_dscm_kernel, C=C, H=H, W=W)

    def full(arr):
        return pl.BlockSpec(arr.shape, lambda b: (0, 0))

    out = pl.pallas_call(
        kern,
        out_shape=jax.ShapeDtypeStruct((B, C, HW), jnp.float32),
        grid=(B,),
        in_specs=[
            pl.BlockSpec((1, C, HW), lambda b: (b, 0, 0)),       # x (lane-dense HW)
            full(p["wconv"]),                                    # all 3x3 weights, bf16
            full(p["w1x1"]),                                     # all 1x1 weights, bf16
            full(p["vecs"]),                                     # all bias/shift cols, f32
            full(p["masks"]),                                    # 27 border masks
            pl.BlockSpec(memory_space=pltpu.MemorySpace.SMEM),   # gamma scalar
        ],
        out_specs=pl.BlockSpec((1, C, HW), lambda b: (b, 0, 0)),
        compiler_params=pltpu.CompilerParams(
            dimension_semantics=("parallel",)),                  # 1 image / TensorCore
    )(xf, p["wconv"], p["w1x1"], p["vecs"], p["masks"], p["gamma"])
    return out.reshape(B, C, H, W)


# -------------------------------- parameters ---------------------------------

def init_params(key, C, H, W):
    # TODO(synk): BatchNorm layers run in eval (inference) mode: running stats and
    # affine params are folded into per-channel scale/shift (scales folded into the
    # conv weights on the host).
    ks = jax.random.split(key, 24)
    eps = 1e-5

    def rnd(k, shape, s=0.1):
        return jax.random.normal(k, shape, jnp.float32) * s

    p = {}
    # --- raw module parameters (kept for the pure-JAX reference) -------------
    w3 = rnd(ks[0], (3, 3, C, C))                        # HWIO, shared by 3 branches
    bias3 = rnd(ks[1], (C,))
    bn_g = 1.0 + rnd(ks[2], (3, C))
    bn_b = rnd(ks[3], (3, C))
    bn_m = rnd(ks[4], (3, C))
    bn_v = jnp.abs(1.0 + rnd(ks[5], (3, C)))
    scale = bn_g / jnp.sqrt(bn_v + eps)
    shift = bn_b - bn_m * scale
    w1 = rnd(ks[6], (2 * C,))                            # conv1 (gate) weight
    w1b = rnd(ks[7], ())
    wd = rnd(ks[8], (C, 2 * C))                          # dconv1
    bd = rnd(ks[9], (C,))
    wc = rnd(ks[10], (C, 2 * C))                         # conv1x1[0]
    bc = rnd(ks[11], (C,))
    w331 = rnd(ks[12], (3, 3, C, C // 2))                # conv3x3_1[0], HWIO
    b331 = rnd(ks[13], (C // 2,))
    w332 = rnd(ks[14], (3, 3, C // 2, 2))                # conv3x3_2[0], HWIO
    b332 = rnd(ks[15], (2,))
    wl = rnd(ks[16], (C, C))                             # conv_last (no bias)
    gl = 1.0 + rnd(ks[17], (C,))
    bl = rnd(ks[18], (C,))
    ml = rnd(ks[19], (C,))
    vl = jnp.abs(1.0 + rnd(ks[20], (C,)))
    sl = gl / jnp.sqrt(vl + eps)
    tl = bl - ml * sl

    s1, s2, s3 = scale[0], scale[1], scale[2]
    t1 = shift[0] + bias3 * s1      # branch 1 uses self.conv3x3 (bias folded in)
    t2, t3 = shift[1], shift[2]     # branches 2/3 use F.conv2d (weight only)

    p.update(w3=w3, s1=s1, s2=s2, s3=s3, t1=t1, t2=t2, t3=t3,
             w1=w1, w1b=w1b, wd=wd, bd=bd, wc=wc, bc=bc,
             w331=w331, b331=b331, w332=w332, b332=b332,
             wl=wl, sl=sl, tl=tl)
    # gamma: torch initializes it to zeros(1); use a nonzero value so the
    # attention/fusion path actually contributes to the output.
    p["gamma"] = jnp.array([0.25], jnp.float32)

    # --- packed kernel inputs -------------------------------------------------
    w3r = jnp.transpose(w3, (3, 0, 1, 2)).reshape(C, 9 * C)          # (Cout, 9*Cin)
    w331r = jnp.pad(jnp.transpose(w331, (3, 0, 1, 2)),
                    ((0, C - C // 2), (0, 0), (0, 0), (0, 0))).reshape(C, 9 * C)
    w332r = jnp.pad(jnp.transpose(w332, (3, 0, 1, 2)),
                    ((0, C - 2), (0, 0), (0, 0), (0, C - C // 2))).reshape(C, 9 * C)
    b331p = jnp.pad(b331, (0, C - C // 2))
    b332p = jnp.pad(b332, (0, C - 2))

    p["wconv"] = jnp.concatenate(
        [w3r * s1[:, None], w3r * s2[:, None], w3r * s3[:, None],
         w331r, w332r], axis=0).astype(jnp.bfloat16)                  # (5C, 9C)

    wl_scaled = wl * sl[:, None]                                      # fold BN scale
    wcg = jnp.concatenate([wc, w1.reshape(1, 2 * C)], axis=0)         # (C+1, 2C)
    p["w1x1"] = jnp.concatenate(
        [wd, jnp.pad(wl_scaled, ((0, 0), (0, C))), wcg],
        axis=0).astype(jnp.bfloat16)                                  # (3C+1, 2C)

    def col(v):   # length-<=C vector -> (C+1, 1) column, zero-padded
        v = v.reshape(-1, 1)
        return jnp.pad(v, ((0, C + 1 - v.shape[0]), (0, 0)))
    bcg = jnp.concatenate([bc.reshape(C, 1), w1b.reshape(1, 1)], axis=0)
    p["vecs"] = jnp.concatenate(
        [col(t1), col(t2), col(t3), col(bd), bcg,
         col(b331p), col(b332p), col(tl)], axis=1)                    # (C+1, 8) f32

    p["masks"] = _build_masks(H, W)                                   # (27, H*W) f32
    return p


# -------------------------- pure-JAX reference check -------------------------

def reference(x, p):
    def conv(xx, w, pad, dil):
        return lax.conv_general_dilated(
            xx, w, window_strides=(1, 1), padding=((pad, pad), (pad, pad)),
            rhs_dilation=(dil, dil), dimension_numbers=("NCHW", "HWIO", "NCHW"))

    def aff(v):
        return v.reshape(1, -1, 1, 1)

    b1 = conv(x, p["w3"], 1, 1) * aff(p["s1"]) + aff(p["t1"])
    b2 = conv(x, p["w3"], 2, 2) * aff(p["s2"]) + aff(p["t2"])
    b3 = conv(x, p["w3"], 4, 4) * aff(p["s3"]) + aff(p["t3"])

    def attention(a, b):
        feat = jnp.concatenate([a, b], axis=1)                        # (B, 2C, H, W)
        g = jnp.einsum("bchw,c->bhw", feat, p["w1"])[:, None] + p["w1b"]
        g = jax.nn.sigmoid(jnp.maximum(g, 0.0))
        out = jnp.einsum("bchw,oc->bohw", feat * g, p["wd"]) + aff(p["bd"])
        f = jnp.maximum(jnp.einsum("bchw,oc->bohw", feat, p["wc"]) + aff(p["bc"]), 0.0)
        f2 = jnp.maximum(conv(f, p["w331"], 1, 1) + aff(p["b331"]), 0.0)
        att = conv(f2, p["w332"], 1, 1) + aff(p["b332"])
        att = jax.nn.softmax(att, axis=1)
        return out, att

    out1, att = attention(b1, b2)
    fusion = att[:, 0:1] * b1 + att[:, 1:2] * b2 + out1
    out2, att1 = attention(fusion, b3)
    gm = p["gamma"][0]
    pre = att1[:, 0:1] * fusion + att1[:, 1:2] * b3 + out2
    ax = jnp.maximum(gm * pre + (1.0 - gm) * x, 0.0)
    y = jnp.einsum("bchw,oc->bohw", ax, p["wl"]) * aff(p["sl"]) + aff(p["tl"])
    return jnp.maximum(y, 0.0)


# ----------------------------------- main ------------------------------------

if __name__ == "__main__":
    key = jax.random.PRNGKey(0)
    kx, kp = jax.random.split(key)
    B, C, H, W = 2, 8, 16, 16              # NCHW; in_channels must be even
    x = jax.random.normal(kx, (B, C, H, W), jnp.float32)
    params = init_params(kp, C, H, W)

    y = jax.jit(lambda xx: dscm_forward(xx, params))(x)
    y = jax.block_until_ready(y)
    assert y.shape == (B, C, H, W)

    y_ref = reference(x, params)
    err = float(jnp.max(jnp.abs(y - y_ref)))
    # bf16 MXU operands (f32 accumulation) + approx-reciprocal sigmoid/softmax
    # loosen exact parity with the pure-f32 reference slightly.
    assert err < 4e-2, f"mismatch vs reference: max abs err = {err}"
    print("KERNEL_OK")
</pallas_src>

<mosaic_0001>
module attributes {stable_mosaic.version = 11 : i64} {
  func.func @_dscm_kernel(%arg0: i32, %arg1: memref<1x8x256xf32, #tpu.memory_space<vmem>>, %arg2: memref<40x72xbf16, #tpu.memory_space<vmem>>, %arg3: memref<25x16xbf16, #tpu.memory_space<vmem>>, %arg4: memref<9x8xf32, #tpu.memory_space<vmem>>, %arg5: memref<27x256xf32, #tpu.memory_space<vmem>>, %arg6: memref<1xf32, #tpu.memory_space<smem>>, %arg7: memref<1x8x256xf32, #tpu.memory_space<vmem>>) attributes {dimension_semantics = [#tpu.dimension_semantics<parallel>], iteration_bounds = array<i64: 2>, scalar_prefetch = 0 : i64, scratch_operands = 0 : i64, tpu.core_type = #tpu.core_type<tc>, window_params = [{transform_indices = @transform_0, window_bounds = array<i64: 1, 8, 256>}, {pipeline_mode = #tpu.pipeline_mode<synchronous>, transform_indices = @transform_1, window_bounds = array<i64: 40, 72>}, {pipeline_mode = #tpu.pipeline_mode<synchronous>, transform_indices = @transform_2, window_bounds = array<i64: 25, 16>}, {pipeline_mode = #tpu.pipeline_mode<synchronous>, transform_indices = @transform_3, window_bounds = array<i64: 9, 8>}, {pipeline_mode = #tpu.pipeline_mode<synchronous>, transform_indices = @transform_4, window_bounds = array<i64: 27, 256>}, {transform_indices = @transform_5, window_bounds = array<i64: 1>}, {transform_indices = @transform_6, window_bounds = array<i64: 1, 8, 256>}]} {
    %c0 = arith.constant 0 : index
    %c0_0 = arith.constant 0 : index
    %c0_1 = arith.constant 0 : index
    %0 = vector.load %arg1[%c0, %c0_0, %c0_1] : memref<1x8x256xf32, #tpu.memory_space<vmem>>, vector<1x8x256xf32>
    %1 = vector.shape_cast %0 : vector<1x8x256xf32> to vector<8x256xf32>
    %c0_2 = arith.constant 0 : index
    %c0_3 = arith.constant 0 : index
    %2 = vector.load %arg2[%c0_2, %c0_3] : memref<40x72xbf16, #tpu.memory_space<vmem>>, vector<8x72xbf16>
    %c8 = arith.constant 8 : index
    %c0_4 = arith.constant 0 : index
    %3 = vector.load %arg2[%c8, %c0_4] : memref<40x72xbf16, #tpu.memory_space<vmem>>, vector<8x72xbf16>
    %c16 = arith.constant 16 : index
    %c0_5 = arith.constant 0 : index
    %4 = vector.load %arg2[%c16, %c0_5] : memref<40x72xbf16, #tpu.memory_space<vmem>>, vector<8x72xbf16>
    %c24 = arith.constant 24 : index
    %c0_6 = arith.constant 0 : index
    %5 = vector.load %arg2[%c24, %c0_6] : memref<40x72xbf16, #tpu.memory_space<vmem>>, vector<8x72xbf16>
    %c32 = arith.constant 32 : index
    %c0_7 = arith.constant 0 : index
    %6 = vector.load %arg2[%c32, %c0_7] : memref<40x72xbf16, #tpu.memory_space<vmem>>, vector<8x72xbf16>
    %c0_8 = arith.constant 0 : index
    %c0_9 = arith.constant 0 : index
    %7 = vector.load %arg3[%c0_8, %c0_9] : memref<25x16xbf16, #tpu.memory_space<vmem>>, vector<8x16xbf16>
    %c8_10 = arith.constant 8 : index
    %c0_11 = arith.constant 0 : index
    %8 = vector.load %arg3[%c8_10, %c0_11] : memref<25x16xbf16, #tpu.memory_space<vmem>>, vector<8x8xbf16>
    %c16_12 = arith.constant 16 : index
    %c0_13 = arith.constant 0 : index
    %9 = vector.load %arg3[%c16_12, %c0_13] : memref<25x16xbf16, #tpu.memory_space<vmem>>, vector<9x16xbf16>
    %c0_14 = arith.constant 0 : index
    %c0_15 = arith.constant 0 : index
    %10 = vector.load %arg4[%c0_14, %c0_15] : memref<9x8xf32, #tpu.memory_space<vmem>>, vector<9x8xf32>
    %11 = vector.extract_strided_slice %10 {offsets = [0, 0], sizes = [8, 1], strides = [1, 1]} : vector<9x8xf32> to vector<8x1xf32>
    %12 = vector.extract_strided_slice %10 {offsets = [0, 1], sizes = [8, 1], strides = [1, 1]} : vector<9x8xf32> to vector<8x1xf32>
    %13 = vector.extract_strided_slice %10 {offsets = [0, 2], sizes = [8, 1], strides = [1, 1]} : vector<9x8xf32> to vector<8x1xf32>
    %14 = vector.extract_strided_slice %10 {offsets = [0, 3], sizes = [8, 1], strides = [1, 1]} : vector<9x8xf32> to vector<8x1xf32>
    %15 = vector.extract_strided_slice %10 {offsets = [0, 4], sizes = [9, 1], strides = [1, 1]} : vector<9x8xf32> to vector<9x1xf32>
    %16 = vector.extract_strided_slice %10 {offsets = [0, 5], sizes = [8, 1], strides = [1, 1]} : vector<9x8xf32> to vector<8x1xf32>
    %17 = vector.extract_strided_slice %10 {offsets = [0, 6], sizes = [8, 1], strides = [1, 1]} : vector<9x8xf32> to vector<8x1xf32>
    %18 = vector.extract_strided_slice %10 {offsets = [0, 7], sizes = [8, 1], strides = [1, 1]} : vector<9x8xf32> to vector<8x1xf32>
    %c17_i32 = arith.constant 17 : i32
    %19 = tpu.dynamic_rotate %1 by %c17_i32 dim 1 : vector<8x256xf32>, i32 -> vector<8x256xf32>
    %c0_16 = arith.constant 0 : index
    %c0_17 = arith.constant 0 : index
    %20 = vector.load %arg5[%c0_16, %c0_17] : memref<27x256xf32, #tpu.memory_space<vmem>>, vector<1x256xf32>
    %21 = vector.broadcast %20 : vector<1x256xf32> to vector<8x256xf32>
    %22 = arith.mulf %19, %21 : vector<8x256xf32>
    %c16_i32 = arith.constant 16 : i32
    %23 = tpu.dynamic_rotate %1 by %c16_i32 dim 1 : vector<8x256xf32>, i32 -> vector<8x256xf32>
    %c1 = arith.constant 1 : index
    %c0_18 = arith.constant 0 : index
    %24 = vector.load %arg5[%c1, %c0_18] : memref<27x256xf32, #tpu.memory_space<vmem>>, vector<1x256xf32>
    %25 = vector.broadcast %24 : vector<1x256xf32> to vector<8x256xf32>
    %26 = arith.mulf %23, %25 : vector<8x256xf32>
    %c15_i32 = arith.constant 15 : i32
    %27 = tpu.dynamic_rotate %1 by %c15_i32 dim 1 : vector<8x256xf32>, i32 -> vector<8x256xf32>
    %c2 = arith.constant 2 : index
    %c0_19 = arith.constant 0 : index
    %28 = vector.load %arg5[%c2, %c0_19] : memref<27x256xf32, #tpu.memory_space<vmem>>, vector<1x256xf32>
    %29 = vector.broadcast %28 : vector<1x256xf32> to vector<8x256xf32>
    %30 = arith.mulf %27, %29 : vector<8x256xf32>
    %c1_i32 = arith.constant 1 : i32
    %31 = tpu.dynamic_rotate %1 by %c1_i32 dim 1 : vector<8x256xf32>, i32 -> vector<8x256xf32>
    %c3 = arith.constant 3 : index
    %c0_20 = arith.constant 0 : index
    %32 = vector.load %arg5[%c3, %c0_20] : memref<27x256xf32, #tpu.memory_space<vmem>>, vector<1x256xf32>
    %33 = vector.broadcast %32 : vector<1x256xf32> to vector<8x256xf32>
    %34 = arith.mulf %31, %33 : vector<8x256xf32>
    %c255_i32 = arith.constant 255 : i32
    %35 = tpu.dynamic_rotate %1 by %c255_i32 dim 1 : vector<8x256xf32>, i32 -> vector<8x256xf32>
    %c5 = arith.constant 5 : index
    %c0_21 = arith.constant 0 : index
    %36 = vector.load %arg5[%c5, %c0_21] : memref<27x256xf32, #tpu.memory_space<vmem>>, vector<1x256xf32>
    %37 = vector.broadcast %36 : vector<1x256xf32> to vector<8x256xf32>
    %38 = arith.mulf %35, %37 : vector<8x256xf32>
    %c241_i32 = arith.constant 241 : i32
    %39 = tpu.dynamic_rotate %1 by %c241_i32 dim 1 : vector<8x256xf32>, i32 -> vector<8x256xf32>
    %c6 = arith.constant 6 : index
    %c0_22 = arith.constant 0 : index
    %40 = vector.load %arg5[%c6, %c0_22] : memref<27x256xf32, #tpu.memory_space<vmem>>, vector<1x256xf32>
    %41 = vector.broadcast %40 : vector<1x256xf32> to vector<8x256xf32>
    %42 = arith.mulf %39, %41 : vector<8x256xf32>
    %c240_i32 = arith.constant 240 : i32
    %43 = tpu.dynamic_rotate %1 by %c240_i32 dim 1 : vector<8x256xf32>, i32 -> vector<8x256xf32>
    %c7 = arith.constant 7 : index
    %c0_23 = arith.constant 0 : index
    %44 = vector.load %arg5[%c7, %c0_23] : memref<27x256xf32, #tpu.memory_space<vmem>>, vector<1x256xf32>
    %45 = vector.broadcast %44 : vector<1x256xf32> to vector<8x256xf32>
    %46 = arith.mulf %43, %45 : vector<8x256xf32>
    %c239_i32 = arith.constant 239 : i32
    %47 = tpu.dynamic_rotate %1 by %c239_i32 dim 1 : vector<8x256xf32>, i32 -> vector<8x256xf32>
    %c8_24 = arith.constant 8 : index
    %c0_25 = arith.constant 0 : index
    %48 = vector.load %arg5[%c8_24, %c0_25] : memref<27x256xf32, #tpu.memory_space<vmem>>, vector<1x256xf32>
    %49 = vector.broadcast %48 : vector<1x256xf32> to vector<8x256xf32>
    %50 = arith.mulf %47, %49 : vector<8x256xf32>
    %51 = tpu.concatenate %22, %26, %30, %34, %1, %38, %42, %46, %50 in 0 : vector<8x256xf32>, vector<8x256xf32>, vector<8x256xf32>, vector<8x256xf32>, vector<8x256xf32>, vector<8x256xf32>, vector<8x256xf32>, vector<8x256xf32>, vector<8x256xf32> -> vector<72x256xf32>
    %52 = arith.truncf %51 : vector<72x256xf32> to vector<72x256xbf16>
    %cst = arith.constant dense<0.000000e+00> : vector<8x256xf32>
    %53 = tpu.matmul %2, %52, %cst {dimension_numbers = #tpu.dot_dimension_numbers<[1], [0], [0], [1], [0, 0, 1, 1], [], []>} : vector<8x72xbf16>, vector<72x256xbf16>, vector<8x256xf32> -> vector<8x256xf32>
    %54 = vector.broadcast %11 : vector<8x1xf32> to vector<8x256xf32>
    %55 = arith.addf %53, %54 : vector<8x256xf32>
    %c34_i32 = arith.constant 34 : i32
    %56 = tpu.dynamic_rotate %1 by %c34_i32 dim 1 : vector<8x256xf32>, i32 -> vector<8x256xf32>
    %c9 = arith.constant 9 : index
    %c0_26 = arith.constant 0 : index
    %57 = vector.load %arg5[%c9, %c0_26] : memref<27x256xf32, #tpu.memory_space<vmem>>, vector<1x256xf32>
    %58 = vector.broadcast %57 : vector<1x256xf32> to vector<8x256xf32>
    %59 = arith.mulf %56, %58 : vector<8x256xf32>
    %c32_i32 = arith.constant 32 : i32
    %60 = tpu.dynamic_rotate %1 by %c32_i32 dim 1 : vector<8x256xf32>, i32 -> vector<8x256xf32>
    %c10 = arith.constant 10 : index
    %c0_27 = arith.constant 0 : index
    %61 = vector.load %arg5[%c10, %c0_27] : memref<27x256xf32, #tpu.memory_space<vmem>>, vector<1x256xf32>
    %62 = vector.broadcast %61 : vector<1x256xf32> to vector<8x256xf32>
    %63 = arith.mulf %60, %62 : vector<8x256xf32>
    %c30_i32 = arith.constant 30 : i32
    %64 = tpu.dynamic_rotate %1 by %c30_i32 dim 1 : vector<8x256xf32>, i32 -> vector<8x256xf32>
    %c11 = arith.constant 11 : index
    %c0_28 = arith.constant 0 : index
    %65 = vector.load %arg5[%c11, %c0_28] : memref<27x256xf32, #tpu.memory_space<vmem>>, vector<1x256xf32>
    %66 = vector.broadcast %65 : vector<1x256xf32> to vector<8x256xf32>
    %67 = arith.mulf %64, %66 : vector<8x256xf32>
    %c2_i32 = arith.constant 2 : i32
    %68 = tpu.dynamic_rotate %1 by %c2_i32 dim 1 : vector<8x256xf32>, i32 -> vector<8x256xf32>
    %c12 = arith.constant 12 : index
    %c0_29 = arith.constant 0 : index
    %69 = vector.load %arg5[%c12, %c0_29] : memref<27x256xf32, #tpu.memory_space<vmem>>, vector<1x256xf32>
    %70 = vector.broadcast %69 : vector<1x256xf32> to vector<8x256xf32>
    %71 = arith.mulf %68, %70 : vector<8x256xf32>
    %c254_i32 = arith.constant 254 : i32
    %72 = tpu.dynamic_rotate %1 by %c254_i32 dim 1 : vector<8x256xf32>, i32 -> vector<8x256xf32>
    %c14 = arith.constant 14 : index
    %c0_30 = arith.constant 0 : index
    %73 = vector.load %arg5[%c14, %c0_30] : memref<27x256xf32, #tpu.memory_space<vmem>>, vector<1x256xf32>
    %74 = vector.broadcast %73 : vector<1x256xf32> to vector<8x256xf32>
    %75 = arith.mulf %72, %74 : vector<8x256xf32>
    %c226_i32 = arith.constant 226 : i32
    %76 = tpu.dynamic_rotate %1 by %c226_i32 dim 1 : vector<8x256xf32>, i32 -> vector<8x256xf32>
    %c15 = arith.constant 15 : index
    %c0_31 = arith.constant 0 : index
    %77 = vector.load %arg5[%c15, %c0_31] : memref<27x256xf32, #tpu.memory_space<vmem>>, vector<1x256xf32>
    %78 = vector.broadcast %77 : vector<1x256xf32> to vector<8x256xf32>
    %79 = arith.mulf %76, %78 : vector<8x256xf32>
    %c224_i32 = arith.constant 224 : i32
    %80 = tpu.dynamic_rotate %1 by %c224_i32 dim 1 : vector<8x256xf32>, i32 -> vector<8x256xf32>
    %c16_32 = arith.constant 16 : index
    %c0_33 = arith.constant 0 : index
    %81 = vector.load %arg5[%c16_32, %c0_33] : memref<27x256xf32, #tpu.memory_space<vmem>>, vector<1x256xf32>
    %82 = vector.broadcast %81 : vector<1x256xf32> to vector<8x256xf32>
    %83 = arith.mulf %80, %82 : vector<8x256xf32>
    %c222_i32 = arith.constant 222 : i32
    %84 = tpu.dynamic_rotate %1 by %c222_i32 dim 1 : vector<8x256xf32>, i32 -> vector<8x256xf32>
    %c17 = arith.constant 17 : index
    %c0_34 = arith.constant 0 : index
    %85 = vector.load %arg5[%c17, %c0_34] : memref<27x256xf32, #tpu.memory_space<vmem>>, vector<1x256xf32>
    %86 = vector.broadcast %85 : vector<1x256xf32> to vector<8x256xf32>
    %87 = arith.mulf %84, %86 : vector<8x256xf32>
    %88 = tpu.concatenate %59, %63, %67, %71, %1, %75, %79, %83, %87 in 0 : vector<8x256xf32>, vector<8x256xf32>, vector<8x256xf32>, vector<8x256xf32>, vector<8x256xf32>, vector<8x256xf32>, vector<8x256xf32>, vector<8x256xf32>, vector<8x256xf32> -> vector<72x256xf32>
    %89 = arith.truncf %88 : vector<72x256xf32> to vector<72x256xbf16>
    %cst_35 = arith.constant dense<0.000000e+00> : vector<8x256xf32>
    %90 = tpu.matmul %3, %89, %cst_35 {dimension_numbers = #tpu.dot_dimension_numbers<[1], [0], [0], [1], [0, 0, 1, 1], [], []>} : vector<8x72xbf16>, vector<72x256xbf16>, vector<8x256xf32> -> vector<8x256xf32>
    %91 = vector.broadcast %12 : vector<8x1xf32> to vector<8x256xf32>
    %92 = arith.addf %90, %91 : vector<8x256xf32>
    %c68_i32 = arith.constant 68 : i32
    %93 = tpu.dynamic_rotate %1 by %c68_i32 dim 1 : vector<8x256xf32>, i32 -> vector<8x256xf32>
    %c18 = arith.constant 18 : index
    %c0_36 = arith.constant 0 : index
    %94 = vector.load %arg5[%c18, %c0_36] : memref<27x256xf32, #tpu.memory_space<vmem>>, vector<1x256xf32>
    %95 = vector.broadcast %94 : vector<1x256xf32> to vector<8x256xf32>
    %96 = arith.mulf %93, %95 : vector<8x256xf32>
    %c64_i32 = arith.constant 64 : i32
    %97 = tpu.dynamic_rotate %1 by %c64_i32 dim 1 : vector<8x256xf32>, i32 -> vector<8x256xf32>
    %c19 = arith.constant 19 : index
    %c0_37 = arith.constant 0 : index
    %98 = vector.load %arg5[%c19, %c0_37] : memref<27x256xf32, #tpu.memory_space<vmem>>, vector<1x256xf32>
    %99 = vector.broadcast %98 : vector<1x256xf32> to vector<8x256xf32>
    %100 = arith.mulf %97, %99 : vector<8x256xf32>
    %c60_i32 = arith.constant 60 : i32
    %101 = tpu.dynamic_rotate %1 by %c60_i32 dim 1 : vector<8x256xf32>, i32 -> vector<8x256xf32>
    %c20 = arith.constant 20 : index
    %c0_38 = arith.constant 0 : index
    %102 = vector.load %arg5[%c20, %c0_38] : memref<27x256xf32, #tpu.memory_space<vmem>>, vector<1x256xf32>
    %103 = vector.broadcast %102 : vector<1x256xf32> to vector<8x256xf32>
    %104 = arith.mulf %101, %103 : vector<8x256xf32>
    %c4_i32 = arith.constant 4 : i32
    %105 = tpu.dynamic_rotate %1 by %c4_i32 dim 1 : vector<8x256xf32>, i32 -> vector<8x256xf32>
    %c21 = arith.constant 21 : index
    %c0_39 = arith.constant 0 : index
    %106 = vector.load %arg5[%c21, %c0_39] : memref<27x256xf32, #tpu.memory_space<vmem>>, vector<1x256xf32>
    %107 = vector.broadcast %106 : vector<1x256xf32> to vector<8x256xf32>
    %108 = arith.mulf %105, %107 : vector<8x256xf32>
    %c252_i32 = arith.constant 252 : i32
    %109 = tpu.dynamic_rotate %1 by %c252_i32 dim 1 : vector<8x256xf32>, i32 -> vector<8x256xf32>
    %c23 = arith.constant 23 : index
    %c0_40 = arith.constant 0 : index
    %110 = vector.load %arg5[%c23, %c0_40] : memref<27x256xf32, #tpu.memory_space<vmem>>, vector<1x256xf32>
    %111 = vector.broadcast %110 : vector<1x256xf32> to vector<8x256xf32>
    %112 = arith.mulf %109, %111 : vector<8x256xf32>
    %c196_i32 = arith.constant 196 : i32
    %113 = tpu.dynamic_rotate %1 by %c196_i32 dim 1 : vector<8x256xf32>, i32 -> vector<8x256xf32>
    %c24_41 = arith.constant 24 : index
    %c0_42 = arith.constant 0 : index
    %114 = vector.load %arg5[%c24_41, %c0_42] : memref<27x256xf32, #tpu.memory_space<vmem>>, vector<1x256xf32>
    %115 = vector.broadcast %114 : vector<1x256xf32> to vector<8x256xf32>
    %116 = arith.mulf %113, %115 : vector<8x256xf32>
    %c192_i32 = arith.constant 192 : i32
    %117 = tpu.dynamic_rotate %1 by %c192_i32 dim 1 : vector<8x256xf32>, i32 -> vector<8x256xf32>
    %c25 = arith.constant 25 : index
    %c0_43 = arith.constant 0 : index
    %118 = vector.load %arg5[%c25, %c0_43] : memref<27x256xf32, #tpu.memory_space<vmem>>, vector<1x256xf32>
    %119 = vector.broadcast %118 : vector<1x256xf32> to vector<8x256xf32>
    %120 = arith.mulf %117, %119 : vector<8x256xf32>
    %c188_i32 = arith.constant 188 : i32
    %121 = tpu.dynamic_rotate %1 by %c188_i32 dim 1 : vector<8x256xf32>, i32 -> vector<8x256xf32>
    %c26 = arith.constant 26 : index
    %c0_44 = arith.constant 0 : index
    %122 = vector.load %arg5[%c26, %c0_44] : memref<27x256xf32, #tpu.memory_space<vmem>>, vector<1x256xf32>
    %123 = vector.broadcast %122 : vector<1x256xf32> to vector<8x256xf32>
    %124 = arith.mulf %121, %123 : vector<8x256xf32>
    %125 = tpu.concatenate %96, %100, %104, %108, %1, %112, %116, %120, %124 in 0 : vector<8x256xf32>, vector<8x256xf32>, vector<8x256xf32>, vector<8x256xf32>, vector<8x256xf32>, vector<8x256xf32>, vector<8x256xf32>, vector<8x256xf32>, vector<8x256xf32> -> vector<72x256xf32>
    %126 = arith.truncf %125 : vector<72x256xf32> to vector<72x256xbf16>
    %cst_45 = arith.constant dense<0.000000e+00> : vector<8x256xf32>
    %127 = tpu.matmul %4, %126, %cst_45 {dimension_numbers = #tpu.dot_dimension_numbers<[1], [0], [0], [1], [0, 0, 1, 1], [], []>} : vector<8x72xbf16>, vector<72x256xbf16>, vector<8x256xf32> -> vector<8x256xf32>
    %128 = vector.broadcast %13 : vector<8x1xf32> to vector<8x256xf32>
    %129 = arith.addf %127, %128 : vector<8x256xf32>
    %130 = tpu.concatenate %55, %92 in 0 : vector<8x256xf32>, vector<8x256xf32> -> vector<16x256xf32>
    %131 = arith.truncf %130 : vector<16x256xf32> to vector<16x256xbf16>
    %cst_46 = arith.constant dense<0.000000e+00> : vector<9x256xf32>
    %132 = tpu.matmul %9, %131, %cst_46 {dimension_numbers = #tpu.dot_dimension_numbers<[1], [0], [0], [1], [0, 0, 1, 1], [], []>} : vector<9x16xbf16>, vector<16x256xbf16>, vector<9x256xf32> -> vector<9x256xf32>
    %133 = vector.broadcast %15 : vector<9x1xf32> to vector<9x256xf32>
    %134 = arith.addf %132, %133 : vector<9x256xf32>
    %cst_47 = arith.constant 0.000000e+00 : f32
    %135 = vector.broadcast %cst_47 : f32 to vector<9x256xf32>
    %136 = arith.maximumf %134, %135 : vector<9x256xf32>
    %137 = vector.extract_strided_slice %136 {offsets = [0, 0], sizes = [8, 256], strides = [1, 1]} : vector<9x256xf32> to vector<8x256xf32>
    %138 = vector.extract_strided_slice %136 {offsets = [8, 0], sizes = [1, 256], strides = [1, 1]} : vector<9x256xf32> to vector<1x256xf32>
    %cst_48 = arith.constant 0.000000e+00 : f32
    %139 = vector.broadcast %cst_48 : f32 to vector<1x256xf32>
    %140 = arith.subf %139, %138 : vector<1x256xf32>
    %141 = math.exp %140 : vector<1x256xf32>
    %cst_49 = arith.constant 1.000000e+00 : f32
    %142 = vector.broadcast %cst_49 : f32 to vector<1x256xf32>
    %143 = arith.addf %142, %141 : vector<1x256xf32>
    %144 = tpu.reciprocal %143 {approx = true} : vector<1x256xf32> -> vector<1x256xf32>
    %145 = vector.broadcast %144 : vector<1x256xf32> to vector<16x256xf32>
    %146 = arith.mulf %130, %145 : vector<16x256xf32>
    %147 = arith.truncf %146 : vector<16x256xf32> to vector<16x256xbf16>
    %cst_50 = arith.constant dense<0.000000e+00> : vector<8x256xf32>
    %148 = tpu.matmul %7, %147, %cst_50 {dimension_numbers = #tpu.dot_dimension_numbers<[1], [0], [0], [1], [0, 0, 1, 1], [], []>} : vector<8x16xbf16>, vector<16x256xbf16>, vector<8x256xf32> -> vector<8x256xf32>
    %149 = vector.broadcast %14 : vector<8x1xf32> to vector<8x256xf32>
    %150 = arith.addf %148, %149 : vector<8x256xf32>
    %c17_i32_51 = arith.constant 17 : i32
    %151 = tpu.dynamic_rotate %137 by %c17_i32_51 dim 1 : vector<8x256xf32>, i32 -> vector<8x256xf32>
    %c0_52 = arith.constant 0 : index
    %c0_53 = arith.constant 0 : index
    %152 = vector.load %arg5[%c0_52, %c0_53] : memref<27x256xf32, #tpu.memory_space<vmem>>, vector<1x256xf32>
    %153 = vector.broadcast %152 : vector<1x256xf32> to vector<8x256xf32>
    %154 = arith.mulf %151, %153 : vector<8x256xf32>
    %c16_i32_54 = arith.constant 16 : i32
    %155 = tpu.dynamic_rotate %137 by %c16_i32_54 dim 1 : vector<8x256xf32>, i32 -> vector<8x256xf32>
    %c1_55 = arith.constant 1 : index
    %c0_56 = arith.constant 0 : index
    %156 = vector.load %arg5[%c1_55, %c0_56] : memref<27x256xf32, #tpu.memory_space<vmem>>, vector<1x256xf32>
    %157 = vector.broadcast %156 : vector<1x256xf32> to vector<8x256xf32>
    %158 = arith.mulf %155, %157 : vector<8x256xf32>
    %c15_i32_57 = arith.constant 15 : i32
    %159 = tpu.dynamic_rotate %137 by %c15_i32_57 dim 1 : vector<8x256xf32>, i32 -> vector<8x256xf32>
    %c2_58 = arith.constant 2 : index
    %c0_59 = arith.constant 0 : index
    %160 = vector.load %arg5[%c2_58, %c0_59] : memref<27x256xf32, #tpu.memory_space<vmem>>, vector<1x256xf32>
    %161 = vector.broadcast %160 : vector<1x256xf32> to vector<8x256xf32>
    %162 = arith.mulf %159, %161 : vector<8x256xf32>
    %c1_i32_60 = arith.constant 1 : i32
    %163 = tpu.dynamic_rotate %137 by %c1_i32_60 dim 1 : vector<8x256xf32>, i32 -> vector<8x256xf32>
    %c3_61 = arith.constant 3 : index
    %c0_62 = arith.constant 0 : index
    %164 = vector.load %arg5[%c3_61, %c0_62] : memref<27x256xf32, #tpu.memory_space<vmem>>, vector<1x256xf32>
    %165 = vector.broadcast %164 : vector<1x256xf32> to vector<8x256xf32>
    %166 = arith.mulf %163, %165 : vector<8x256xf32>
    %c255_i32_63 = arith.constant 255 : i32
    %167 = tpu.dynamic_rotate %137 by %c255_i32_63 dim 1 : vector<8x256xf32>, i32 -> vector<8x256xf32>
    %c5_64 = arith.constant 5 : index
    %c0_65 = arith.constant 0 : index
    %168 = vector.load %arg5[%c5_64, %c0_65] : memref<27x256xf32, #tpu.memory_space<vmem>>, vector<1x256xf32>
    %169 = vector.broadcast %168 : vector<1x256xf32> to vector<8x256xf32>
    %170 = arith.mulf %167, %169 : vector<8x256xf32>
    %c241_i32_66 = arith.constant 241 : i32
    %171 = tpu.dynamic_rotate %137 by %c241_i32_66 dim 1 : vector<8x256xf32>, i32 -> vector<8x256xf32>
    %c6_67 = arith.constant 6 : index
    %c0_68 = arith.constant 0 : index
    %172 = vector.load %arg5[%c6_67, %c0_68] : memref<27x256xf32, #tpu.memory_space<vmem>>, vector<1x256xf32>
    %173 = vector.broadcast %172 : vector<1x256xf32> to vector<8x256xf32>
    %174 = arith.mulf %171, %173 : vector<8x256xf32>
    %c240_i32_69 = arith.constant 240 : i32
    %175 = tpu.dynamic_rotate %137 by %c240_i32_69 dim 1 : vector<8x256xf32>, i32 -> vector<8x256xf32>
    %c7_70 = arith.constant 7 : index
    %c0_71 = arith.constant 0 : index
    %176 = vector.load %arg5[%c7_70, %c0_71] : memref<27x256xf32, #tpu.memory_space<vmem>>, vector<1x256xf32>
    %177 = vector.broadcast %176 : vector<1x256xf32> to vector<8x256xf32>
    %178 = arith.mulf %175, %177 : vector<8x256xf32>
    %c239_i32_72 = arith.constant 239 : i32
    %179 = tpu.dynamic_rotate %137 by %c239_i32_72 dim 1 : vector<8x256xf32>, i32 -> vector<8x256xf32>
    %c8_73 = arith.constant 8 : index
    %c0_74 = arith.constant 0 : index
    %180 = vector.load %arg5[%c8_73, %c0_74] : memref<27x256xf32, #tpu.memory_space<vmem>>, vector<1x256xf32>
    %181 = vector.broadcast %180 : vector<1x256xf32> to vector<8x256xf32>
    %182 = arith.mulf %179, %181 : vector<8x256xf32>
    %183 = tpu.concatenate %154, %158, %162, %166, %137, %170, %174, %178, %182 in 0 : vector<8x256xf32>, vector<8x256xf32>, vector<8x256xf32>, vector<8x256xf32>, vector<8x256xf32>, vector<8x256xf32>, vector<8x256xf32>, vector<8x256xf32>, vector<8x256xf32> -> vector<72x256xf32>
    %184 = arith.truncf %183 : vector<72x256xf32> to vector<72x256xbf16>
    %cst_75 = arith.constant dense<0.000000e+00> : vector<8x256xf32>
    %185 = tpu.matmul %5, %184, %cst_75 {dimension_numbers = #tpu.dot_dimension_numbers<[1], [0], [0], [1], [0, 0, 1, 1], [], []>} : vector<8x72xbf16>, vector<72x256xbf16>, vector<8x256xf32> -> vector<8x256xf32>
    %186 = vector.broadcast %16 : vector<8x1xf32> to vector<8x256xf32>
    %187 = arith.addf %185, %186 : vector<8x256xf32>
    %cst_76 = arith.constant 0.000000e+00 : f32
    %188 = vector.broadcast %cst_76 : f32 to vector<8x256xf32>
    %189 = arith.maximumf %187, %188 : vector<8x256xf32>
    %c17_i32_77 = arith.constant 17 : i32
    %190 = tpu.dynamic_rotate %189 by %c17_i32_77 dim 1 : vector<8x256xf32>, i32 -> vector<8x256xf32>
    %c0_78 = arith.constant 0 : index
    %c0_79 = arith.constant 0 : index
    %191 = vector.load %arg5[%c0_78, %c0_79] : memref<27x256xf32, #tpu.memory_space<vmem>>, vector<1x256xf32>
    %192 = vector.broadcast %191 : vector<1x256xf32> to vector<8x256xf32>
    %193 = arith.mulf %190, %192 : vector<8x256xf32>
    %c16_i32_80 = arith.constant 16 : i32
    %194 = tpu.dynamic_rotate %189 by %c16_i32_80 dim 1 : vector<8x256xf32>, i32 -> vector<8x256xf32>
    %c1_81 = arith.constant 1 : index
    %c0_82 = arith.constant 0 : index
    %195 = vector.load %arg5[%c1_81, %c0_82] : memref<27x256xf32, #tpu.memory_space<vmem>>, vector<1x256xf32>
    %196 = vector.broadcast %195 : vector<1x256xf32> to vector<8x256xf32>
    %197 = arith.mulf %194, %196 : vector<8x256xf32>
    %c15_i32_83 = arith.constant 15 : i32
    %198 = tpu.dynamic_rotate %189 by %c15_i32_83 dim 1 : vector<8x256xf32>, i32 -> vector<8x256xf32>
    %c2_84 = arith.constant 2 : index
    %c0_85 = arith.constant 0 : index
    %199 = vector.load %arg5[%c2_84, %c0_85] : memref<27x256xf32, #tpu.memory_space<vmem>>, vector<1x256xf32>
    %200 = vector.broadcast %199 : vector<1x256xf32> to vector<8x256xf32>
    %201 = arith.mulf %198, %200 : vector<8x256xf32>
    %c1_i32_86 = arith.constant 1 : i32
    %202 = tpu.dynamic_rotate %189 by %c1_i32_86 dim 1 : vector<8x256xf32>, i32 -> vector<8x256xf32>
    %c3_87 = arith.constant 3 : index
    %c0_88 = arith.constant 0 : index
    %203 = vector.load %arg5[%c3_87, %c0_88] : memref<27x256xf32, #tpu.memory_space<vmem>>, vector<1x256xf32>
    %204 = vector.broadcast %203 : vector<1x256xf32> to vector<8x256xf32>
    %205 = arith.mulf %202, %204 : vector<8x256xf32>
    %c255_i32_89 = arith.constant 255 : i32
    %206 = tpu.dynamic_rotate %189 by %c255_i32_89 dim 1 : vector<8x256xf32>, i32 -> vector<8x256xf32>
    %c5_90 = arith.constant 5 : index
    %c0_91 = arith.constant 0 : index
    %207 = vector.load %arg5[%c5_90, %c0_91] : memref<27x256xf32, #tpu.memory_space<vmem>>, vector<1x256xf32>
    %208 = vector.broadcast %207 : vector<1x256xf32> to vector<8x256xf32>
    %209 = arith.mulf %206, %208 : vector<8x256xf32>
    %c241_i32_92 = arith.constant 241 : i32
    %210 = tpu.dynamic_rotate %189 by %c241_i32_92 dim 1 : vector<8x256xf32>, i32 -> vector<8x256xf32>
    %c6_93 = arith.constant 6 : index
    %c0_94 = arith.constant 0 : index
    %211 = vector.load %arg5[%c6_93, %c0_94] : memref<27x256xf32, #tpu.memory_space<vmem>>, vector<1x256xf32>
    %212 = vector.broadcast %211 : vector<1x256xf32> to vector<8x256xf32>
    %213 = arith.mulf %210, %212 : vector<8x256xf32>
    %c240_i32_95 = arith.constant 240 : i32
    %214 = tpu.dynamic_rotate %189 by %c240_i32_95 dim 1 : vector<8x256xf32>, i32 -> vector<8x256xf32>
    %c7_96 = arith.constant 7 : index
    %c0_97 = arith.constant 0 : index
    %215 = vector.load %arg5[%c7_96, %c0_97] : memref<27x256xf32, #tpu.memory_space<vmem>>, vector<1x256xf32>
    %216 = vector.broadcast %215 : vector<1x256xf32> to vector<8x256xf32>
    %217 = arith.mulf %214, %216 : vector<8x256xf32>
    %c239_i32_98 = arith.constant 239 : i32
    %218 = tpu.dynamic_rotate %189 by %c239_i32_98 dim 1 : vector<8x256xf32>, i32 -> vector<8x256xf32>
    %c8_99 = arith.constant 8 : index
    %c0_100 = arith.constant 0 : index
    %219 = vector.load %arg5[%c8_99, %c0_100] : memref<27x256xf32, #tpu.memory_space<vmem>>, vector<1x256xf32>
    %220 = vector.broadcast %219 : vector<1x256xf32> to vector<8x256xf32>
    %221 = arith.mulf %218, %220 : vector<8x256xf32>
    %222 = tpu.concatenate %193, %197, %201, %205, %189, %209, %213, %217, %221 in 0 : vector<8x256xf32>, vector<8x256xf32>, vector<8x256xf32>, vector<8x256xf32>, vector<8x256xf32>, vector<8x256xf32>, vector<8x256xf32>, vector<8x256xf32>, vector<8x256xf32> -> vector<72x256xf32>
    %223 = arith.truncf %222 : vector<72x256xf32> to vector<72x256xbf16>
    %cst_101 = arith.constant dense<0.000000e+00> : vector<8x256xf32>
    %224 = tpu.matmul %6, %223, %cst_101 {dimension_numbers = #tpu.dot_dimension_numbers<[1], [0], [0], [1], [0, 0, 1, 1], [], []>} : vector<8x72xbf16>, vector<72x256xbf16>, vector<8x256xf32> -> vector<8x256xf32>
    %225 = vector.broadcast %17 : vector<8x1xf32> to vector<8x256xf32>
    %226 = arith.addf %224, %225 : vector<8x256xf32>
    %227 = vector.extract_strided_slice %226 {offsets = [0, 0], sizes = [1, 256], strides = [1, 1]} : vector<8x256xf32> to vector<1x256xf32>
    %228 = vector.extract_strided_slice %226 {offsets = [1, 0], sizes = [1, 256], strides = [1, 1]} : vector<8x256xf32> to vector<1x256xf32>
    %229 = arith.maximumf %227, %228 : vector<1x256xf32>
    %230 = arith.subf %227, %229 : vector<1x256xf32>
    %231 = math.exp %230 : vector<1x256xf32>
    %232 = arith.subf %228, %229 : vector<1x256xf32>
    %233 = math.exp %232 : vector<1x256xf32>
    %234 = arith.addf %231, %233 : vector<1x256xf32>
    %235 = tpu.reciprocal %234 {approx = true} : vector<1x256xf32> -> vector<1x256xf32>
    %236 = arith.mulf %231, %235 : vector<1x256xf32>
    %237 = arith.mulf %233, %235 : vector<1x256xf32>
    %238 = vector.broadcast %236 : vector<1x256xf32> to vector<8x256xf32>
    %239 = arith.mulf %238, %55 : vector<8x256xf32>
    %240 = vector.broadcast %237 : vector<1x256xf32> to vector<8x256xf32>
    %241 = arith.mulf %240, %92 : vector<8x256xf32>
    %242 = arith.addf %239, %241 : vector<8x256xf32>
    %243 = arith.addf %242, %150 : vector<8x256xf32>
    %244 = tpu.concatenate %243, %129 in 0 : vector<8x256xf32>, vector<8x256xf32> -> vector<16x256xf32>
    %245 = arith.truncf %244 : vector<16x256xf32> to vector<16x256xbf16>
    %cst_102 = arith.constant dense<0.000000e+00> : vector<9x256xf32>
    %246 = tpu.matmul %9, %245, %cst_102 {dimension_numbers = #tpu.dot_dimension_numbers<[1], [0], [0], [1], [0, 0, 1, 1], [], []>} : vector<9x16xbf16>, vector<16x256xbf16>, vector<9x256xf32> -> vector<9x256xf32>
    %247 = vector.broadcast %15 : vector<9x1xf32> to vector<9x256xf32>
    %248 = arith.addf %246, %247 : vector<9x256xf32>
    %cst_103 = arith.constant 0.000000e+00 : f32
    %249 = vector.broadcast %cst_103 : f32 to vector<9x256xf32>
    %250 = arith.maximumf %248, %249 : vector<9x256xf32>
    %251 = vector.extract_strided_slice %250 {offsets = [0, 0], sizes = [8, 256], strides = [1, 1]} : vector<9x256xf32> to vector<8x256xf32>
    %252 = vector.extract_strided_slice %250 {offsets = [8, 0], sizes = [1, 256], strides = [1, 1]} : vector<9x256xf32> to vector<1x256xf32>
    %cst_104 = arith.constant 0.000000e+00 : f32
    %253 = vector.broadcast %cst_104 : f32 to vector<1x256xf32>
    %254 = arith.subf %253, %252 : vector<1x256xf32>
    %255 = math.exp %254 : vector<1x256xf32>
    %cst_105 = arith.constant 1.000000e+00 : f32
    %256 = vector.broadcast %cst_105 : f32 to vector<1x256xf32>
    %257 = arith.addf %256, %255 : vector<1x256xf32>
    %258 = tpu.reciprocal %257 {approx = true} : vector<1x256xf32> -> vector<1x256xf32>
    %259 = vector.broadcast %258 : vector<1x256xf32> to vector<16x256xf32>
    %260 = arith.mulf %244, %259 : vector<16x256xf32>
    %261 = arith.truncf %260 : vector<16x256xf32> to vector<16x256xbf16>
    %cst_106 = arith.constant dense<0.000000e+00> : vector<8x256xf32>
    %262 = tpu.matmul %7, %261, %cst_106 {dimension_numbers = #tpu.dot_dimension_numbers<[1], [0], [0], [1], [0, 0, 1, 1], [], []>} : vector<8x16xbf16>, vector<16x256xbf16>, vector<8x256xf32> -> vector<8x256xf32>
    %263 = vector.broadcast %14 : vector<8x1xf32> to vector<8x256xf32>
    %264 = arith.addf %262, %263 : vector<8x256xf32>
    %c17_i32_107 = arith.constant 17 : i32
    %265 = tpu.dynamic_rotate %251 by %c17_i32_107 dim 1 : vector<8x256xf32>, i32 -> vector<8x256xf32>
    %c0_108 = arith.constant 0 : index
    %c0_109 = arith.constant 0 : index
    %266 = vector.load %arg5[%c0_108, %c0_109] : memref<27x256xf32, #tpu.memory_space<vmem>>, vector<1x256xf32>
    %267 = vector.broadcast %266 : vector<1x256xf32> to vector<8x256xf32>
    %268 = arith.mulf %265, %267 : vector<8x256xf32>
    %c16_i32_110 = arith.constant 16 : i32
    %269 = tpu.dynamic_rotate %251 by %c16_i32_110 dim 1 : vector<8x256xf32>, i32 -> vector<8x256xf32>
    %c1_111 = arith.constant 1 : index
    %c0_112 = arith.constant 0 : index
    %270 = vector.load %arg5[%c1_111, %c0_112] : memref<27x256xf32, #tpu.memory_space<vmem>>, vector<1x256xf32>
    %271 = vector.broadcast %270 : vector<1x256xf32> to vector<8x256xf32>
    %272 = arith.mulf %269, %271 : vector<8x256xf32>
    %c15_i32_113 = arith.constant 15 : i32
    %273 = tpu.dynamic_rotate %251 by %c15_i32_113 dim 1 : vector<8x256xf32>, i32 -> vector<8x256xf32>
    %c2_114 = arith.constant 2 : index
    %c0_115 = arith.constant 0 : index
    %274 = vector.load %arg5[%c2_114, %c0_115] : memref<27x256xf32, #tpu.memory_space<vmem>>, vector<1x256xf32>
    %275 = vector.broadcast %274 : vector<1x256xf32> to vector<8x256xf32>
    %276 = arith.mulf %273, %275 : vector<8x256xf32>
    %c1_i32_116 = arith.constant 1 : i32
    %277 = tpu.dynamic_rotate %251 by %c1_i32_116 dim 1 : vector<8x256xf32>, i32 -> vector<8x256xf32>
    %c3_117 = arith.constant 3 : index
    %c0_118 = arith.constant 0 : index
    %278 = vector.load %arg5[%c3_117, %c0_118] : memref<27x256xf32, #tpu.memory_space<vmem>>, vector<1x256xf32>
    %279 = vector.broadcast %278 : vector<1x256xf32> to vector<8x256xf32>
    %280 = arith.mulf %277, %279 : vector<8x256xf32>
    %c255_i32_119 = arith.constant 255 : i32
    %281 = tpu.dynamic_rotate %251 by %c255_i32_119 dim 1 : vector<8x256xf32>, i32 -> vector<8x256xf32>
    %c5_120 = arith.constant 5 : index
    %c0_121 = arith.constant 0 : index
    %282 = vector.load %arg5[%c5_120, %c0_121] : memref<27x256xf32, #tpu.memory_space<vmem>>, vector<1x256xf32>
    %283 = vector.broadcast %282 : vector<1x256xf32> to vector<8x256xf32>
    %284 = arith.mulf %281, %283 : vector<8x256xf32>
    %c241_i32_122 = arith.constant 241 : i32
    %285 = tpu.dynamic_rotate %251 by %c241_i32_122 dim 1 : vector<8x256xf32>, i32 -> vector<8x256xf32>
    %c6_123 = arith.constant 6 : index
    %c0_124 = arith.constant 0 : index
    %286 = vector.load %arg5[%c6_123, %c0_124] : memref<27x256xf32, #tpu.memory_space<vmem>>, vector<1x256xf32>
    %287 = vector.broadcast %286 : vector<1x256xf32> to vector<8x256xf32>
    %288 = arith.mulf %285, %287 : vector<8x256xf32>
    %c240_i32_125 = arith.constant 240 : i32
    %289 = tpu.dynamic_rotate %251 by %c240_i32_125 dim 1 : vector<8x256xf32>, i32 -> vector<8x256xf32>
    %c7_126 = arith.constant 7 : index
    %c0_127 = arith.constant 0 : index
    %290 = vector.load %arg5[%c7_126, %c0_127] : memref<27x256xf32, #tpu.memory_space<vmem>>, vector<1x256xf32>
    %291 = vector.broadcast %290 : vector<1x256xf32> to vector<8x256xf32>
    %292 = arith.mulf %289, %291 : vector<8x256xf32>
    %c239_i32_128 = arith.constant 239 : i32
    %293 = tpu.dynamic_rotate %251 by %c239_i32_128 dim 1 : vector<8x256xf32>, i32 -> vector<8x256xf32>
    %c8_129 = arith.constant 8 : index
    %c0_130 = arith.constant 0 : index
    %294 = vector.load %arg5[%c8_129, %c0_130] : memref<27x256xf32, #tpu.memory_space<vmem>>, vector<1x256xf32>
    %295 = vector.broadcast %294 : vector<1x256xf32> to vector<8x256xf32>
    %296 = arith.mulf %293, %295 : vector<8x256xf32>
    %297 = tpu.concatenate %268, %272, %276, %280, %251, %284, %288, %292, %296 in 0 : vector<8x256xf32>, vector<8x256xf32>, vector<8x256xf32>, vector<8x256xf32>, vector<8x256xf32>, vector<8x256xf32>, vector<8x256xf32>, vector<8x256xf32>, vector<8x256xf32> -> vector<72x256xf32>
    %298 = arith.truncf %297 : vector<72x256xf32> to vector<72x256xbf16>
    %cst_131 = arith.constant dense<0.000000e+00> : vector<8x256xf32>
    %299 = tpu.matmul %5, %298, %cst_131 {dimension_numbers = #tpu.dot_dimension_numbers<[1], [0], [0], [1], [0, 0, 1, 1], [], []>} : vector<8x72xbf16>, vector<72x256xbf16>, vector<8x256xf32> -> vector<8x256xf32>
    %300 = vector.broadcast %16 : vector<8x1xf32> to vector<8x256xf32>
    %301 = arith.addf %299, %300 : vector<8x256xf32>
    %cst_132 = arith.constant 0.000000e+00 : f32
    %302 = vector.broadcast %cst_132 : f32 to vector<8x256xf32>
    %303 = arith.maximumf %301, %302 : vector<8x256xf32>
    %c17_i32_133 = arith.constant 17 : i32
    %304 = tpu.dynamic_rotate %303 by %c17_i32_133 dim 1 : vector<8x256xf32>, i32 -> vector<8x256xf32>
    %c0_134 = arith.constant 0 : index
    %c0_135 = arith.constant 0 : index
    %305 = vector.load %arg5[%c0_134, %c0_135] : memref<27x256xf32, #tpu.memory_space<vmem>>, vector<1x256xf32>
    %306 = vector.broadcast %305 : vector<1x256xf32> to vector<8x256xf32>
    %307 = arith.mulf %304, %306 : vector<8x256xf32>
    %c16_i32_136 = arith.constant 16 : i32
    %308 = tpu.dynamic_rotate %303 by %c16_i32_136 dim 1 : vector<8x256xf32>, i32 -> vector<8x256xf32>
    %c1_137 = arith.constant 1 : index
    %c0_138 = arith.constant 0 : index
    %309 = vector.load %arg5[%c1_137, %c0_138] : memref<27x256xf32, #tpu.memory_space<vmem>>, vector<1x256xf32>
    %310 = vector.broadcast %309 : vector<1x256xf32> to vector<8x256xf32>
    %311 = arith.mulf %308, %310 : vector<8x256xf32>
    %c15_i32_139 = arith.constant 15 : i32
    %312 = tpu.dynamic_rotate %303 by %c15_i32_139 dim 1 : vector<8x256xf32>, i32 -> vector<8x256xf32>
    %c2_140 = arith.constant 2 : index
    %c0_141 = arith.constant 0 : index
    %313 = vector.load %arg5[%c2_140, %c0_141] : memref<27x256xf32, #tpu.memory_space<vmem>>, vector<1x256xf32>
    %314 = vector.broadcast %313 : vector<1x256xf32> to vector<8x256xf32>
    %315 = arith.mulf %312, %314 : vector<8x256xf32>
    %c1_i32_142 = arith.constant 1 : i32
    %316 = tpu.dynamic_rotate %303 by %c1_i32_142 dim 1 : vector<8x256xf32>, i32 -> vector<8x256xf32>
    %c3_143 = arith.constant 3 : index
    %c0_144 = arith.constant 0 : index
    %317 = vector.load %arg5[%c3_143, %c0_144] : memref<27x256xf32, #tpu.memory_space<vmem>>, vector<1x256xf32>
    %318 = vector.broadcast %317 : vector<1x256xf32> to vector<8x256xf32>
    %319 = arith.mulf %316, %318 : vector<8x256xf32>
    %c255_i32_145 = arith.constant 255 : i32
    %320 = tpu.dynamic_rotate %303 by %c255_i32_145 dim 1 : vector<8x256xf32>, i32 -> vector<8x256xf32>
    %c5_146 = arith.constant 5 : index
    %c0_147 = arith.constant 0 : index
    %321 = vector.load %arg5[%c5_146, %c0_147] : memref<27x256xf32, #tpu.memory_space<vmem>>, vector<1x256xf32>
    %322 = vector.broadcast %321 : vector<1x256xf32> to vector<8x256xf32>
    %323 = arith.mulf %320, %322 : vector<8x256xf32>
    %c241_i32_148 = arith.constant 241 : i32
    %324 = tpu.dynamic_rotate %303 by %c241_i32_148 dim 1 : vector<8x256xf32>, i32 -> vector<8x256xf32>
    %c6_149 = arith.constant 6 : index
    %c0_150 = arith.constant 0 : index
    %325 = vector.load %arg5[%c6_149, %c0_150] : memref<27x256xf32, #tpu.memory_space<vmem>>, vector<1x256xf32>
    %326 = vector.broadcast %325 : vector<1x256xf32> to vector<8x256xf32>
    %327 = arith.mulf %324, %326 : vector<8x256xf32>
    %c240_i32_151 = arith.constant 240 : i32
    %328 = tpu.dynamic_rotate %303 by %c240_i32_151 dim 1 : vector<8x256xf32>, i32 -> vector<8x256xf32>
    %c7_152 = arith.constant 7 : index
    %c0_153 = arith.constant 0 : index
    %329 = vector.load %arg5[%c7_152, %c0_153] : memref<27x256xf32, #tpu.memory_space<vmem>>, vector<1x256xf32>
    %330 = vector.broadcast %329 : vector<1x256xf32> to vector<8x256xf32>
    %331 = arith.mulf %328, %330 : vector<8x256xf32>
    %c239_i32_154 = arith.constant 239 : i32
    %332 = tpu.dynamic_rotate %303 by %c239_i32_154 dim 1 : vector<8x256xf32>, i32 -> vector<8x256xf32>
    %c8_155 = arith.constant 8 : index
    %c0_156 = arith.constant 0 : index
    %333 = vector.load %arg5[%c8_155, %c0_156] : memref<27x256xf32, #tpu.memory_space<vmem>>, vector<1x256xf32>
    %334 = vector.broadcast %333 : vector<1x256xf32> to vector<8x256xf32>
    %335 = arith.mulf %332, %334 : vector<8x256xf32>
    %336 = tpu.concatenate %307, %311, %315, %319, %303, %323, %327, %331, %335 in 0 : vector<8x256xf32>, vector<8x256xf32>, vector<8x256xf32>, vector<8x256xf32>, vector<8x256xf32>, vector<8x256xf32>, vector<8x256xf32>, vector<8x256xf32>, vector<8x256xf32> -> vector<72x256xf32>
    %337 = arith.truncf %336 : vector<72x256xf32> to vector<72x256xbf16>
    %cst_157 = arith.constant dense<0.000000e+00> : vector<8x256xf32>
    %338 = tpu.matmul %6, %337, %cst_157 {dimension_numbers = #tpu.dot_dimension_numbers<[1], [0], [0], [1], [0, 0, 1, 1], [], []>} : vector<8x72xbf16>, vector<72x256xbf16>, vector<8x256xf32> -> vector<8x256xf32>
    %339 = vector.broadcast %17 : vector<8x1xf32> to vector<8x256xf32>
    %340 = arith.addf %338, %339 : vector<8x256xf32>
    %341 = vector.extract_strided_slice %340 {offsets = [0, 0], sizes = [1, 256], strides = [1, 1]} : vector<8x256xf32> to vector<1x256xf32>
    %342 = vector.extract_strided_slice %340 {offsets = [1, 0], sizes = [1, 256], strides = [1, 1]} : vector<8x256xf32> to vector<1x256xf32>
    %343 = arith.maximumf %341, %342 : vector<1x256xf32>
    %344 = arith.subf %341, %343 : vector<1x256xf32>
    %345 = math.exp %344 : vector<1x256xf32>
    %346 = arith.subf %342, %343 : vector<1x256xf32>
    %347 = math.exp %346 : vector<1x256xf32>
    %348 = arith.addf %345, %347 : vector<1x256xf32>
    %349 = tpu.reciprocal %348 {approx = true} : vector<1x256xf32> -> vector<1x256xf32>
    %350 = arith.mulf %345, %349 : vector<1x256xf32>
    %351 = arith.mulf %347, %349 : vector<1x256xf32>
    %352 = vector.broadcast %350 : vector<1x256xf32> to vector<8x256xf32>
    %353 = arith.mulf %352, %243 : vector<8x256xf32>
    %354 = vector.broadcast %351 : vector<1x256xf32> to vector<8x256xf32>
    %355 = arith.mulf %354, %129 : vector<8x256xf32>
    %356 = arith.addf %353, %355 : vector<8x256xf32>
    %357 = arith.addf %356, %264 : vector<8x256xf32>
    %c0_158 = arith.constant 0 : index
    %358 = memref.load %arg6[%c0_158] : memref<1xf32, #tpu.memory_space<smem>>
    %359 = vector.broadcast %358 : f32 to vector<8x256xf32>
    %360 = arith.mulf %359, %357 : vector<8x256xf32>
    %cst_159 = arith.constant 1.000000e+00 : f32
    %361 = arith.subf %cst_159, %358 : f32
    %362 = vector.broadcast %361 : f32 to vector<8x256xf32>
    %363 = arith.mulf %362, %1 : vector<8x256xf32>
    %364 = arith.addf %360, %363 : vector<8x256xf32>
    %cst_160 = arith.constant 0.000000e+00 : f32
    %365 = vector.broadcast %cst_160 : f32 to vector<8x256xf32>
    %366 = arith.maximumf %364, %365 : vector<8x256xf32>
    %367 = arith.truncf %366 : vector<8x256xf32> to vector<8x256xbf16>
    %cst_161 = arith.constant dense<0.000000e+00> : vector<8x256xf32>
    %368 = tpu.matmul %8, %367, %cst_161 {dimension_numbers = #tpu.dot_dimension_numbers<[1], [0], [0], [1], [0, 0, 1, 1], [], []>} : vector<8x8xbf16>, vector<8x256xbf16>, vector<8x256xf32> -> vector<8x256xf32>
    %369 = vector.broadcast %18 : vector<8x1xf32> to vector<8x256xf32>
    %370 = arith.addf %368, %369 : vector<8x256xf32>
    %cst_162 = arith.constant 0.000000e+00 : f32
    %371 = vector.broadcast %cst_162 : f32 to vector<8x256xf32>
    %372 = arith.maximumf %370, %371 : vector<8x256xf32>
    %c0_163 = arith.constant 0 : index
    %c0_164 = arith.constant 0 : index
    %c0_165 = arith.constant 0 : index
    %373 = vector.load %arg7[%c0_163, %c0_164, %c0_165] : memref<1x8x256xf32, #tpu.memory_space<vmem>>, vector<1x8x256xf32>
    %374 = vector.shape_cast %373 : vector<1x8x256xf32> to vector<8x256xf32>
    %375 = vector.shape_cast %372 : vector<8x256xf32> to vector<1x8x256xf32>
    tpu.vector_store %arg7[%c0_163, %c0_164, %c0_165], %375 {strides = array<i32>} : memref<1x8x256xf32, #tpu.memory_space<vmem>>, vector<1x8x256xf32>,
    return
  }
  func.func @transform_0(%arg0: i32) -> (i32, i32, i32) {
    %c0_i32 = arith.constant 0 : i32
    %c0_i32_0 = arith.constant 0 : i32
    %c0_i32_1 = arith.constant 0 : i32
    return %arg0, %c0_i32, %c0_i32_0 : i32, i32, i32
  }
  func.func @transform_1(%arg0: i32) -> (i32, i32) {
    %c0_i32 = arith.constant 0 : i32
    %c0_i32_0 = arith.constant 0 : i32
    %c0_i32_1 = arith.constant 0 : i32
    return %c0_i32, %c0_i32_0 : i32, i32
  }
  func.func @transform_2(%arg0: i32) -> (i32, i32) {
    %c0_i32 = arith.constant 0 : i32
    %c0_i32_0 = arith.constant 0 : i32
    %c0_i32_1 = arith.constant 0 : i32
    return %c0_i32, %c0_i32_0 : i32, i32
  }
  func.func @transform_3(%arg0: i32) -> (i32, i32) {
    %c0_i32 = arith.constant 0 : i32
    %c0_i32_0 = arith.constant 0 : i32
    %c0_i32_1 = arith.constant 0 : i32
    return %c0_i32, %c0_i32_0 : i32, i32
  }
  func.func @transform_4(%arg0: i32) -> (i32, i32) {
    %c0_i32 = arith.constant 0 : i32
    %c0_i32_0 = arith.constant 0 : i32
    %c0_i32_1 = arith.constant 0 : i32
    return %c0_i32, %c0_i32_0 : i32, i32
  }
  func.func @transform_5(%arg0: i32) -> i32 {
    %c0_i32 = arith.constant 0 : i32
    %c0_i32_0 = arith.constant 0 : i32
    return %c0_i32 : i32
  }
  func.func @transform_6(%arg0: i32) -> (i32, i32, i32) {
    %c0_i32 = arith.constant 0 : i32
    %c0_i32_0 = arith.constant 0 : i32
    %c0_i32_1 = arith.constant 0 : i32
    return %arg0, %c0_i32, %c0_i32_0 : i32, i32, i32
  }
}

</mosaic_0001>

<bundles_post_ra>
// kernel: _lambda_.1
= control target key start
LH: loop header
LB: loop body
LE: loop exit
PB: predicated region body
PF: predicated region fallthrough
CT: control target
= control target key end

     0   :  { %s2215_s23 = smov 0   ;;  %s3081_s0 = inlined_call_operand.vmem [shape: f32[2,8,256], index: 0, kind: input, shape index: {}]   ;;  %s3082_s1 = inlined_call_operand.vmem [shape: bf16[40,72], index: 1, kind: input, shape index: {}]   ;;  %s3083_s2 = inlined_call_operand.vmem [shape: bf16[25,16], index: 2, kind: input, shape index: {}]   ;;  %s3084_s3 = inlined_call_operand.vmem [shape: f32[9,8], index: 3, kind: input, shape index: {}]   ;;  %s3085_s4 = inlined_call_operand.vmem [shape: f32[27,256], index: 4, kind: input, shape index: {}]   ;;  %s3086_s5 = inlined_call_operand.<no memory space> [shape: f32[1], index: 5, kind: input, shape index: {}]   ;;  %s3087_s6 = inlined_call_operand.vmem [shape: f32[2,8,256], index: 6, kind: output, shape index: {}]  }
   0x1   :  { %11 = sst [smem:[#allocation2]] %s3086_s5 }
   0x2 LB: > { %s1993_s24 = sadd.s32 4294967295, %s2146_s23   ;;  %p1997_p0 = scmp.ge.s32.totalorder %s2146_s23, 1  ;;  %s2146_s23 = sphi %s2215_s23, %s17_s23  }
   0x3   : > { %p213_p1 = scmp.lt.s32.totalorder %s2146_s23, 3 }
   0x5   : > { %p214_p2 = pnand %p1997_p0, %p213_p1 }
   0x6   : > { %p243_p3 = scmp.lt.s32.totalorder (!%p214_p2), %s1993_s24, 1  ;;  %s2148_s28 = smov (!%p214_p2), 16   ;;  %v2161_v2 = vmov (!%p214_p2), 0   ;;  %v2164_v3 = vmov (!%p214_p2), 1   ;;  %v2293_v4 = vld [vmem:[%s3084_s3] sm:$0xff] (!%p214_p2)  ;;  %v271_v5 = vlaneseq (!%p214_p2) }
   0x7   : > { %217 = sbr.rel (%p214_p2) target bundleno = 2664 (0xa68), region = 44  ;;  %s2149_s29 = smov (!%p214_p2), 17   ;;  %502 = vmatprep.mubr.bf16.mxu0 (!%p214_p2), %v2161_v2  ;;  %742 = vmatprep.mubr.bf16.mxu1 (!%p214_p2), %v2161_v2  ;;  %v276_v10 = vld [vmem:[%s3085_s4] ss:$8 sm:$0x3] (!%p214_p2) }
   0x8   : > { %s2150_s30 = smov (!%p214_p2), 34   ;;  %s2151_s7 = smov (!%p214_p2), 32   ;;  %2087 = vset.pattern.permute.xlu0 (!%p214_p2), %v2161_v2  ;;  %2088 = vset.pattern.permute.xlu1 (!%p214_p2), %v2164_v3  ;;  %v279_v6 = vshrl.u32 (!%p214_p2), %v271_v5, 7  ;;  %v2297_v7 = vand.u32 (!%p214_p2), 127, %v271_v5 }
   0x9   : > { %s2152_s8 = smov (!%p214_p2), 15   ;;  %s2153_s9 = smov (!%p214_p2), 1   ;;  %v2002_v11 = vld [vmem:[%s3085_s4 + $0x1] ss:$8 sm:$0x3] (!%p214_p2) }
   0xa   : > { %s2154_s10 = smov (!%p214_p2), 30   ;;  %s2155_s11 = smov (!%p214_p2), 2   ;;  %v2299_v8 = vsub.s32 (!%p214_p2), 0, %v279_v6  ;;  %v2301_v9 = vsub.s32 (!%p214_p2), 1, %v279_v6  ;;  %vm294_vm0 = vcmp.lt.s32.totalorder (!%p214_p2), %v2297_v7, 16  ;;  %vm273_vm1 = vcmp.lt.s32.totalorder (!%p214_p2), %v2297_v7, 17 }
   0xb   : > { %s2156_s12 = smov (!%p214_p2), 127   ;;  %s2157_s13 = smov (!%p214_p2), 126   ;;  %v2011_v28 = vld [vmem:[%s3085_s4 + $0x11] ss:$8 sm:$0x3] (!%p214_p2)  ;;  %vm515_vm2 = vcmp.lt.s32.totalorder (!%p214_p2), %v2297_v7, 34 }
   0xc   : > { %s2158_s14 = smov (!%p214_p2), 113   ;;  %s2159_s15 = smov (!%p214_p2), 112   ;;  %v2312_v14 = vrot.slane (!%p214_p2), %v276_v10, %v2301_v9  ;;  %v2315_v15 = vrot.slane (!%p214_p2), %v2002_v11, %v2301_v9  ;;  %v2318_v16 = vrot.slane (!%p214_p2), %v276_v10, %v2299_v8  ;;  %v2321_v17 = vrot.slane (!%p214_p2), %v2002_v11, %v2299_v8  ;;  %v2012_v29 = vld [vmem:[%s3085_s4 + $0x12] ss:$8 sm:$0x3] (!%p214_p2) }
   0xd   : > { %s2160_s16 = smov (!%p214_p2), 98   ;;  %s2162_s17 = smov (!%p214_p2), 96   ;;  %vm537_vm3 = vcmp.lt.s32.totalorder (!%p214_p2), %v2297_v7, 32  ;;  %v528_v34 = vrot.slane (!%p214_p2), %v2011_v28, %v2301_v9  ;;  %v550_v35 = vrot.slane (!%p214_p2), %v2012_v29, %v2301_v9  ;;  %v524_v36 = vrot.slane (!%p214_p2), %v2011_v28, %v2299_v8  ;;  %v2003_v44 = vld [vmem:[%s3085_s4 + $0x2] ss:$8 sm:$0x3] (!%p214_p2) }
   0xe   : > { %s3089_s24 = smov (!%p243_p3, %s1993_s24), 1  ;;  %s2163_s18 = smov 111   ;;  %v546_v37 = vrot.slane %v2012_v29, %v2299_v8  ;;  %v2004_v49 = vld [vmem:[%s3085_s4 + $0x3] ss:$8 sm:$0x3]  ;;  %vm316_vm4 = vcmp.lt.s32.totalorder %v2297_v7, 15  ;;  %v2355_v54 = vrot.slane %v2003_v44, %v2299_v8  ;;  %v2358_v55 = vrot.slane %v2003_v44, %v2301_v9 }
   0xf   : > { %s2048_s5 = sshll.u32 %s3089_s24, 4  ;;  %s2165_s19 = smov 94   ;;  %vm338_vm5 = vcmp.lt.s32.totalorder %v2297_v7, 1  ;;  %v2362_v56 = vrot.slane %v2004_v49, %v2299_v8  ;;  %v2365_v57 = vrot.slane %v2004_v49, %v2301_v9  ;;  %v2013_v11 = vld [vmem:[%s3085_s4 + $0x13] ss:$8 sm:$0x3] }
  0x10   : > { %s2231_s27 = scalar_lea.vmem %s3081_s0, %s2048_s5  ;;  %vm559_vm6 = vcmp.lt.s32.totalorder %v2297_v7, 30  ;;  %vm581_vm7 = vcmp.lt.s32.totalorder %v2297_v7, 2  ;;  %vm360_vm8 = vcmp.lt.s32.totalorder %v2297_v7, 127  ;;  %vm603_vm9 = vcmp.lt.s32.totalorder %v2297_v7, 126  ;;  %s2168_s25 = smov 64  }
  0x11   : > { %v2234_v0 = vld [vmem:[%s2231_s27] sm:$0xff]  ;;  %v2241_v1 = vld [vmem:[%s2231_s27 + $0x8] sm:$0xff]  ;;  %vm382_vm10 = vcmp.lt.s32.totalorder %v2297_v7, 113  ;;  %vm404_vm11 = vcmp.lt.s32.totalorder %v2297_v7, 112  ;;  %vm625_vm12 = vcmp.lt.s32.totalorder %v2297_v7, 98  ;;  %vm647_vm13 = vcmp.lt.s32.totalorder %v2297_v7, 96 }
  0x12   : > { %290 = vrot.lane.b32.xlu1 %v2234_v0, %s2148_s28  ;;  %267 = vrot.lane.b32.xlu0 %v2234_v0, %s2149_s29  ;;  %vm426_vm14 = vcmp.lt.s32.totalorder %v2297_v7, 111  ;;  %vm669_vm15 = vcmp.lt.s32.totalorder %v2297_v7, 94  ;;  %s2169_s26 = smov 68  }
  0x16   : > { %292 = vrot.lane.b32.xlu1 %v2241_v1, %s2148_s28  ;;  %269 = vrot.lane.b32.xlu0 %v2241_v1, %s2149_s29 }
  0x1a   : > { %513 = vrot.lane.b32.xlu1 %v2241_v1, %s2150_s30  ;;  %511 = vrot.lane.b32.xlu0 %v2234_v0, %s2150_s30 }
  0x1e   : > { %535 = vrot.lane.b32.xlu1 %v2241_v1, %s2151_s7  ;;  %533 = vrot.lane.b32.xlu0 %v2234_v0, %s2151_s7 }
  0x22   : > { %314 = vrot.lane.b32.xlu1 %v2241_v1, %s2152_s8  ;;  %312 = vrot.lane.b32.xlu0 %v2234_v0, %s2152_s8 }
  0x26   : > { %336 = vrot.lane.b32.xlu1 %v2241_v1, %s2153_s9  ;;  %334 = vrot.lane.b32.xlu0 %v2234_v0, %s2153_s9 }
  0x2a   : > { %557 = vrot.lane.b32.xlu1 %v2241_v1, %s2154_s10  ;;  %555 = vrot.lane.b32.xlu0 %v2234_v0, %s2154_s10  ;;  %s2170_s10 = smov 60  }
  0x2e   : > { %579 = vrot.lane.b32.xlu1 %v2241_v1, %s2155_s11  ;;  %577 = vrot.lane.b32.xlu0 %v2234_v0, %s2155_s11  ;;  %s2171_s11 = smov 4  }
  0x32   : > { %358 = vrot.lane.b32.xlu1 %v2241_v1, %s2156_s12  ;;  %356 = vrot.lane.b32.xlu0 %v2234_v0, %s2156_s12 }
  0x36   : > { %601 = vrot.lane.b32.xlu1 %v2241_v1, %s2157_s13  ;;  %599 = vrot.lane.b32.xlu0 %v2234_v0, %s2157_s13  ;;  %s2172_s13 = smov 124  }
  0x3a   : > { %380 = vrot.lane.b32.xlu1 %v2241_v1, %s2158_s14  ;;  %378 = vrot.lane.b32.xlu0 %v2234_v0, %s2158_s14 }
  0x3e   : > { %402 = vrot.lane.b32.xlu1 %v2241_v1, %s2159_s15  ;;  %400 = vrot.lane.b32.xlu0 %v2234_v0, %s2159_s15 }
  0x42   : > { %623 = vrot.lane.b32.xlu1 %v2241_v1, %s2160_s16  ;;  %621 = vrot.lane.b32.xlu0 %v2234_v0, %s2160_s16 }
  0x46   : > { %645 = vrot.lane.b32.xlu1 %v2241_v1, %s2162_s17  ;;  %643 = vrot.lane.b32.xlu0 %v2234_v0, %s2162_s17 }
  0x4a   : > { %424 = vrot.lane.b32.xlu1 %v2241_v1, %s2163_s18  ;;  %422 = vrot.lane.b32.xlu0 %v2234_v0, %s2163_s18 }
  0x4e   : > { %667 = vrot.lane.b32.xlu1 %v2241_v1, %s2165_s19  ;;  %665 = vrot.lane.b32.xlu0 %v2234_v0, %s2165_s19 }
  0x52   : > { %698 = vperm.xlu1 %2088, %v2293_v4   ;;  %456 = vperm.xlu0 %2087, %v2293_v4  }
  0x84   : > { %v291_v12 = vpop.permute.xlu1 %290  ;;  %v268_v13 = vpop.permute.xlu0 %267 }
  0x88   : > { %v293_v18 = vpop.permute.xlu1 %292  ;;  %v270_v19 = vpop.permute.xlu0 %269 }
  0x89   : > { %v296_v20 = vsel %vm294_vm0, %v293_v18, %v291_v12  ;;  %v275_v21 = vsel %vm273_vm1, %v270_v19, %v268_v13  ;;  %v274_v22 = vsel %vm273_vm1, %v268_v13, %v270_v19  ;;  %v295_v23 = vsel %vm294_vm0, %v291_v12, %v293_v18  ;;  %v2014_v12 = vld [vmem:[%s3085_s4 + $0x14] ss:$8 sm:$0x3] }
  0x8a   : > { %v289_v24 = vmul.f32 %v2312_v14, %v274_v22  ;;  %v311_v25 = vmul.f32 %v2315_v15, %v295_v23  ;;  %v288_v26 = vmul.f32 %v2318_v16, %v275_v21  ;;  %v310_v27 = vmul.f32 %v2321_v17, %v296_v20 }
  0x8b   : > { %v568_v21 = vrot.slane %v2013_v11, %v2299_v8  ;;  %v572_v22 = vrot.slane %v2013_v11, %v2301_v9  ;;  %v590_v23 = vrot.slane %v2014_v12, %v2299_v8 }
  0x8c   : > { %v514_v30 = vpop.permute.xlu1 %513  ;;  %v512_v31 = vpop.permute.xlu0 %511  ;;  %v445_v32 = vpack.c.bf16 %v311_v25, %v289_v24  ;;  %v444_v33 = vpack.c.bf16 %v310_v27, %v288_v26  ;;  %v594_v24 = vrot.slane %v2014_v12, %v2301_v9  ;;  %v2005_v25 = vld [vmem:[%s3085_s4 + $0x5] ss:$8 sm:$0x3] }
  0x8d   : > { %v517_v38 = vsel %vm515_vm2, %v514_v30, %v512_v31  ;;  %v516_v39 = vsel %vm515_vm2, %v512_v31, %v514_v30  ;;  %vm463_vm2 = vcmask 1043456  }
  0x8e   : > { %470 = vmatprep.subr.bf16.mxu0 %v445_v32  ;;  %v532_v45 = vmul.f32 %v528_v34, %v516_v39  ;;  %v531_v47 = vmul.f32 %v524_v36, %v517_v38  ;;  %v2396_v32 = vrot.slane %v2005_v25, %v2299_v8  ;;  %v2015_v38 = vld [vmem:[%s3085_s4 + $0x16] ss:$8 sm:$0x3] }
  0x8f   : > { %471 = vmatpush1.bf16.msra.mxu0 %v444_v33  ;;  %v2399_v33 = vrot.slane %v2005_v25, %v2301_v9 }
  0x90   : > { %v536_v40 = vpop.permute.xlu1 %535  ;;  %v534_v41 = vpop.permute.xlu0 %533 }
  0x91   : > { %v539_v42 = vsel %vm537_vm3, %v536_v40, %v534_v41  ;;  %v538_v43 = vsel %vm537_vm3, %v534_v41, %v536_v40  ;;  %vm459_vm3 = vcmask 588800  }
  0x92   : > { %v554_v46 = vmul.f32 %v550_v35, %v538_v43  ;;  %v553_v48 = vmul.f32 %v546_v37, %v539_v42 }
  0x94   : > { %v315_v50 = vpop.permute.xlu1 %314  ;;  %v313_v51 = vpop.permute.xlu0 %312  ;;  %v688_v52 = vpack.c.bf16 %v554_v46, %v532_v45  ;;  %v687_v53 = vpack.c.bf16 %v553_v48, %v531_v47  ;;  %v612_v47 = vrot.slane %v2015_v38, %v2299_v8  ;;  %v616_v48 = vrot.slane %v2015_v38, %v2301_v9 }
  0x95   : > { %v317_v58 = vsel %vm316_vm4, %v313_v51, %v315_v50  ;;  %v318_v59 = vsel %vm316_vm4, %v315_v50, %v313_v51 }
  0x96   : > { %710 = vmatprep.subr.bf16.mxu1 %v688_v52  ;;  %v332_v3 = vmul.f32 %v2355_v54, %v318_v59  ;;  %v333_v5 = vmul.f32 %v2358_v55, %v317_v58 }
  0x97   : > { %711 = vmatpush1.bf16.msra.mxu1 %v687_v53 }
  0x98   : > { %v337_v60 = vpop.permute.xlu1 %336  ;;  %v335_v61 = vpop.permute.xlu0 %334 }
  0x99   : > { %v339_v62 = vsel %vm338_vm5, %v335_v61, %v337_v60  ;;  %v340_v63 = vsel %vm338_vm5, %v337_v60, %v335_v61  ;;  %v2006_v61 = vld [vmem:[%s3085_s4 + $0x6] ss:$8 sm:$0x3] }
  0x9a   : > { %v354_v6 = vmul.f32 %v2362_v56, %v340_v63  ;;  %v355_v10 = vmul.f32 %v2365_v57, %v339_v62  ;;  %v2007_v62 = vld [vmem:[%s3085_s4 + $0x7] ss:$8 sm:$0x3]  ;;  %v2428_v11 = vrot.slane %v2006_v61, %v2301_v9 }
  0x9b   : > { %v2432_v12 = vrot.slane %v2007_v62, %v2299_v8 }
  0x9c   : > { %v558_v13 = vpop.permute.xlu1 %557  ;;  %v556_v18 = vpop.permute.xlu0 %555  ;;  %v447_v19 = vpack.c.bf16 %v355_v10, %v333_v5  ;;  %v446_v20 = vpack.c.bf16 %v354_v6, %v332_v3  ;;  %v2425_v10 = vrot.slane %v2006_v61, %v2299_v8 }
  0x9d   : > { %v560_v26 = vsel %vm559_vm6, %v556_v18, %v558_v13  ;;  %v561_v27 = vsel %vm559_vm6, %v558_v13, %v556_v18  ;;  %v2435_v13 = vrot.slane %v2007_v62, %v2301_v9  ;;  %vm986_vm6 = vcmask 130048  }
  0x9e   : > { %472 = vmatprep.subr.bf16.mxu0 %v447_v19  ;;  %v575_v34 = vmul.f32 %v568_v21, %v561_v27  ;;  %v576_v35 = vmul.f32 %v572_v22, %v560_v26 }
  0x9f   : > { %473 = vmatpush1.bf16.msra.mxu0 %v446_v20 }
  0xa0   : > { %v580_v28 = vpop.permute.xlu1 %579  ;;  %v578_v29 = vpop.permute.xlu0 %577 }
  0xa1   : > { %v582_v30 = vsel %vm581_vm7, %v578_v29, %v580_v28  ;;  %v583_v31 = vsel %vm581_vm7, %v580_v28, %v578_v29  ;;  %v2016_v28 = vld [vmem:[%s3085_s4 + $0x17] ss:$8 sm:$0x3]  ;;  %v2017_v29 = vld [vmem:[%s3085_s4 + $0x20] ss:$8 sm:$0x3] }
  0xa2   : > { %v597_v36 = vmul.f32 %v590_v23, %v583_v31  ;;  %v598_v37 = vmul.f32 %v594_v24, %v582_v30  ;;  %v656_v38 = vrot.slane %v2017_v29, %v2299_v8  ;;  %vm755_vm7 = vcmp.lt.s32.totalorder %v2297_v7, 68 }
  0xa4   : > { %v359_v39 = vpop.permute.xlu1 %358  ;;  %v357_v40 = vpop.permute.xlu0 %356  ;;  %v690_v41 = vpack.c.bf16 %v598_v37, %v576_v35  ;;  %v689_v42 = vpack.c.bf16 %v597_v36, %v575_v34  ;;  %v634_v36 = vrot.slane %v2016_v28, %v2299_v8  ;;  %v638_v37 = vrot.slane %v2016_v28, %v2301_v9  ;;  %v256_v28 = vld [vmem:[%s3082_s1] sm:$0xf] }
  0xa5   : > { %v361_v43 = vsel %vm360_vm8, %v357_v40, %v359_v39  ;;  %v362_v44 = vsel %vm360_vm8, %v359_v39, %v357_v40  ;;  %v660_v39 = vrot.slane %v2017_v29, %v2301_v9  ;;  %v2008_v40 = vld [vmem:[%s3085_s4 + $0x10] ss:$8 sm:$0x3] }
  0xa6   : > { %v376_v45 = vmul.f32 %v2396_v32, %v361_v43  ;;  %v377_v46 = vmul.f32 %v2399_v33, %v362_v44  ;;  %712 = vmatprep.subr.bf16.mxu1 %v690_v41 }
  0xa7   : > { %713 = vmatpush1.bf16.msra.mxu1 %v689_v42 }
  0xa8   : > { %v602_v49 = vpop.permute.xlu1 %601  ;;  %v600_v50 = vpop.permute.xlu0 %599  ;;  %v449_v51 = vpack.c.bf16 %v377_v46, %v2241_v1  ;;  %v448_v52 = vpack.c.bf16 %v376_v45, %v2234_v0 }
  0xa9   : > { %v604_v53 = vsel %vm603_vm9, %v600_v50, %v602_v49  ;;  %v605_v58 = vsel %vm603_vm9, %v602_v49, %v600_v50  ;;  %vm777_vm9 = vcmp.lt.s32.totalorder %v2297_v7, 64 }
  0xaa   : > { %v619_v59 = vmul.f32 %v612_v47, %v604_v53  ;;  %v620_v60 = vmul.f32 %v616_v48, %v605_v58  ;;  %474 = vmatprep.subr.bf16.mxu0 %v449_v51  ;;  %v2466_v47 = vrot.slane %v2008_v40, %v2299_v8  ;;  %v2469_v48 = vrot.slane %v2008_v40, %v2301_v9  ;;  %v2018_v53 = vld [vmem:[%s3085_s4 + $0x21] ss:$8 sm:$0x3] }
  0xab   : > { %475 = vmatpush1.bf16.msra.mxu0 %v448_v52 }
  0xac   : > { %v381_v63 = vpop.permute.xlu1 %380  ;;  %v379_v3 = vpop.permute.xlu0 %378  ;;  %v692_v5 = vpack.c.bf16 %v620_v60, %v2241_v1  ;;  %v691_v6 = vpack.c.bf16 %v619_v59, %v2234_v0 }
  0xad   : > { %v383_v18 = vsel %vm382_vm10, %v379_v3, %v381_v63  ;;  %v384_v19 = vsel %vm382_vm10, %v381_v63, %v379_v3 }
  0xae   : > { %714 = vmatprep.subr.bf16.mxu1 %v692_v5  ;;  %v398_v24 = vmul.f32 %v2425_v10, %v383_v18  ;;  %v399_v25 = vmul.f32 %v2428_v11, %v384_v19  ;;  %v682_v18 = vrot.slane %v2018_v53, %v2301_v9 }
  0xaf   : > { %715 = vmatpush1.bf16.msra.mxu1 %v691_v6  ;;  %v678_v6 = vrot.slane %v2018_v53, %v2299_v8 }
  0xb0   : > { %v403_v20 = vpop.permute.xlu1 %402  ;;  %v401_v21 = vpop.permute.xlu0 %400 }
  0xb1   : > { %v405_v22 = vsel %vm404_vm11, %v401_v21, %v403_v20  ;;  %v406_v23 = vsel %vm404_vm11, %v403_v20, %v401_v21 }
  0xb2   : > { %v420_v26 = vmul.f32 %v2432_v12, %v405_v22  ;;  %v421_v27 = vmul.f32 %v2435_v13, %v406_v23 }
  0xb4   : > { %v624_v30 = vpop.permute.xlu1 %623  ;;  %v622_v31 = vpop.permute.xlu0 %621  ;;  %v451_v34 = vpack.c.bf16 %v421_v27, %v399_v25  ;;  %v450_v35 = vpack.c.bf16 %v420_v26, %v398_v24 }
  0xb5   : > { %v626_v41 = vsel %vm625_vm12, %v622_v31, %v624_v30  ;;  %v627_v42 = vsel %vm625_vm12, %v624_v30, %v622_v31  ;;  %vm799_vm12 = vcmp.lt.s32.totalorder %v2297_v7, 60 }
  0xb6   : > { %476 = vmatprep.subr.bf16.mxu0 %v451_v34  ;;  %v641_v49 = vmul.f32 %v634_v36, %v626_v41  ;;  %v642_v50 = vmul.f32 %v638_v37, %v627_v42  ;;  %v257_v34 = vld [vmem:[%s3082_s1 + $0x4] sm:$0xf]  ;;  %v2166_v36 = vmov 4  }
  0xb7   : > { %477 = vmatpush1.bf16.msra.mxu0 %v450_v35  ;;  %v266_v35 = vld [vmem:[%s3084_s3 + $0x8] sm:$0x1]  ;;  %2089 = vset.pattern.permute.xlu1 %v2166_v36 }
  0xb8   : > { %v646_v43 = vpop.permute.xlu1 %645  ;;  %v644_v44 = vpop.permute.xlu0 %643  ;;  %2090 = vset.pattern.permute.xlu0 %v2166_v36  ;;  %973 = vperm.xlu1 %2089, %v2293_v4   ;;  %v2167_v36 = vmov 5  }
  0xb9   : > { %v648_v45 = vsel %vm647_vm13, %v644_v44, %v646_v43  ;;  %v649_v46 = vsel %vm647_vm13, %v646_v43, %v644_v44  ;;  %978 = vperm.xlu0 %2090, %v266_v35   ;;  %vm821_vm13 = vcmp.lt.s32.totalorder %v2297_v7, 4 }
  0xba   : > { %v663_v51 = vmul.f32 %v656_v38, %v648_v45  ;;  %v664_v52 = vmul.f32 %v660_v39, %v649_v46 }
  0xbc   : > { %v425_v58 = vpop.permute.xlu1 %424  ;;  %v423_v59 = vpop.permute.xlu0 %422  ;;  %v694_v60 = vpack.c.bf16 %v664_v52, %v642_v50  ;;  %v693_v61 = vpack.c.bf16 %v663_v51, %v641_v49 }
  0xbd   : > { %v427_v62 = vsel %vm426_vm14, %v423_v59, %v425_v58  ;;  %v428_v63 = vsel %vm426_vm14, %v425_v58, %v423_v59  ;;  %v2516_v59 = vld [vmem:[%s3083_s2 + $0x8] sm:$0x1f]   ;;  %2091 = vset.pattern.permute.xlu0 %v2167_v36 }
  0xbe   : > { %v442_v3 = vmul.f32 %v2466_v47, %v427_v62  ;;  %v443_v5 = vmul.f32 %v2469_v48, %v428_v63  ;;  %716 = vmatprep.subr.bf16.mxu1 %v694_v60 }
  0xbf   : > { %717 = vmatpush1.bf16.msra.mxu1 %v693_v61 }
  0xc0   : > { %v452_v19 = vpack.c.bf16 %v442_v3, %v442_v3  ;;  %v453_v20 = vpack.c.bf16 %v443_v5, %v443_v5  ;;  %v668_v21 = vpop.permute.xlu1 %667  ;;  %v666_v22 = vpop.permute.xlu0 %665 }
  0xc1   : > { %v670_v23 = vsel %vm669_vm15, %v666_v22, %v668_v21  ;;  %v671_v24 = vsel %vm669_vm15, %v668_v21, %v666_v22  ;;  %vm843_vm15 = vcmp.lt.s32.totalorder %v2297_v7, 124 }
  0xc2   : > { %v685_v25 = vmul.f32 %v678_v6, %v670_v23  ;;  %v686_v26 = vmul.f32 %v682_v18, %v671_v24  ;;  %2009 = vmatprep.subr.msk.bf16.mxu0 %vm463_vm2, %v453_v20  ;;  %v465_v27 = vsel %vm463_vm2, %v452_v19, 0 }
  0xc3   : > { %479 = vmatpush1.bf16.msra.mxu0 %v465_v27 }
  0xc4   : > { %v695_v29 = vpack.c.bf16 %v685_v25, %v685_v25  ;;  %v696_v30 = vpack.c.bf16 %v686_v26, %v686_v26 }
  0xc6   : > { %2019 = vmatprep.subr.msk.bf16.mxu1 %vm463_vm2, %v696_v30  ;;  %2010 = vmatmul.mubr.msk.bf16.vlgmr.msra.gmra.mrb[0].mxu0 %vm459_vm3, %v256_v28  ;;  %v705_v31 = vsel %vm463_vm2, %v695_v29, 0 }
  0xc7   : > { %719 = vmatpush1.bf16.msra.mxu1 %v705_v31  ;;  %961 = vmatprep.mubr.bf16.mxu0 %v2161_v2 }
  0xca   : > { %2020 = vmatmul.mubr.msk.bf16.vlgmr.msra.gmra.mrb[0].mxu1 %vm459_vm3, %v257_v34 }
  0xcb   : > { %1022 = vmatprep.mubr.bf16.mxu1 %v2161_v2 }
  0xd1   : > { %v457_v39 = vpop.permute.xlu0 %456  ;;  %v699_v41 = vpop.permute.xlu1 %698 }
 0x137   : > { %v2521_v60 = vpop.permute.xlu1 %973 }
 0x138   : > { %v2523_v62 = vpop.permute.xlu0 %978 }
 0x199   : > { %v504_v37 = vpop.f32.mrb[0].mxu0 }
 0x19a   : > { %v506_v38 = vpop.f32.mrb[1].mxu0  ;;  %v2505_v46 = vadd.f32 %v504_v37, %v457_v39 }
 0x19b   : > { %v508_v40 = vpop.f32.mrb[2].mxu0  ;;  %v2501_v44 = vadd.f32 %v506_v38, %v457_v39 }
 0x19c   : > { %v509_v42 = vpop.f32.mrb[3].mxu0 }
 0x19d   : > { %v744_v43 = vpop.f32.mrb[0].mxu1 }
 0x19e   : > { %v2503_v45 = vadd.f32 %v744_v43, %v699_v41  ;;  %v746_v49 = vpop.f32.mrb[1].mxu1 }
 0x19f   : > { %v2507_v50 = vadd.f32 %v746_v49, %v699_v41  ;;  %v748_v51 = vpop.f32.mrb[2].mxu1 }
 0x1a0   : > { %v749_v52 = vpop.f32.mrb[3].mxu1  ;;  %v970_v58 = vpack.c.bf16 %v2503_v45, %v2505_v46 }
 0x1a1   : > { %v971_v53 = vpack.c.bf16 %v2507_v50, %v2501_v44 }
 0x1a3   : > { %990 = vmatprep.subr.bf16.mxu1 %v971_v53 }
 0x1a4   : > { %991 = vmatpush1.bf16.msra.mxu1 %v970_v58 }
 0x1a7   : > { %2032 = vmatmul.mubr.msk.bf16.vlgmr.msra.gmra.mrb[4].mxu1 %vm986_vm6, %v2516_v59 }
 0x1a8   : > { %1100 = vmatprep.mubr.bf16.mxu1 %v2161_v2 }
 0x27a   : > { %v1024_v61 = vpop.f32.mrb[4].mxu1 }
 0x27b   : > { %v1025_v63 = vadd.f32 %v1024_v61, %v2521_v60  ;;  %v1026_v3 = vpop.f32.mrb[5].mxu1 }
 0x27c   : > { %v1028_v5 = vpop.f32.mrb[6].mxu1  ;;  %v1027_v18 = vadd.f32 %v1026_v3, %v2521_v60 }
 0x27d   : > { %v2526_v6 = vmax.f32 %v1025_v63, 0.0  ;;  %v1029_v19 = vadd.f32 %v1028_v5, %v2523_v62  ;;  %v1030_v20 = vpop.f32.mrb[7].mxu1 }
 0x27e   : > { %v1031_v21 = vadd.f32 %v1030_v20, %v2523_v62  ;;  %v2535_v24 = vmax.f32 %v1027_v18, 0.0 }
 0x27f   : > { %v1035_v22 = vmax.f32 %v1029_v19, 0.0  ;;  %1117 = vrot.lane.b32.xlu0 %v2526_v6, %s2148_s28  ;;  %1109 = vrot.lane.b32.xlu1 %v2526_v6, %s2149_s29 }
 0x280   : > { %v1036_v23 = vmax.f32 %v1031_v21, 0.0 }
 0x281   : > { %v1037_v25 = vsub.f32 0.0, %v1035_v22 }
 0x282   : > { %v1038_v26 = vsub.f32 0.0, %v1036_v23 }
 0x283   : > { %v1039_v27 = vmul.f32 1.442695, %v1037_v25  ;;  %1125 = vrot.lane.b32.xlu0 %v2526_v6, %s2152_s8  ;;  %1111 = vrot.lane.b32.xlu1 %v2535_v24, %s2149_s29 }
 0x284   : > { %v1041_v28 = vmul.f32 1.442695, %v1038_v26 }
 0x285   : > { %2097 = vpow2.f32 %v1039_v27 }
 0x286   : > { %2099 = vpow2.f32 %v1041_v28 }
 0x287   : > { %1133 = vrot.lane.b32.xlu0 %v2526_v6, %s2153_s9  ;;  %1119 = vrot.lane.b32.xlu1 %v2535_v24, %s2148_s28 }
 0x28b   : > { %1141 = vrot.lane.b32.xlu0 %v2526_v6, %s2156_s12  ;;  %1127 = vrot.lane.b32.xlu1 %v2535_v24, %s2152_s8 }
 0x28f   : > { %v2098_v29 = vpop.eup %2097  ;;  %1149 = vrot.lane.b32.xlu0 %v2526_v6, %s2158_s14  ;;  %1135 = vrot.lane.b32.xlu1 %v2535_v24, %s2153_s9 }
 0x290   : > { %v2100_v30 = vpop.eup %2099  ;;  %v1043_v31 = vadd.f32 1.0, %v2098_v29 }
 0x291   : > { %v1044_v34 = vadd.f32 1.0, %v2100_v30 }
 0x292   : > { %2101 = vrcp.f32 %v1043_v31 }
 0x293   : > { %2103 = vrcp.f32 %v1044_v34  ;;  %1157 = vrot.lane.b32.xlu0 %v2526_v6, %s2159_s15  ;;  %1143 = vrot.lane.b32.xlu1 %v2535_v24, %s2156_s12 }
 0x297   : > { %1165 = vrot.lane.b32.xlu0 %v2526_v6, %s2163_s18  ;;  %1151 = vrot.lane.b32.xlu1 %v2535_v24, %s2158_s14 }
 0x29b   : > { %1159 = vrot.lane.b32.xlu1 %v2535_v24, %s2159_s15  ;;  %1184 = vperm.xlu0 %2091, %v2293_v4   ;;  %v2577_v4 = vld [vmem:[%s3083_s2] sm:$0xf] }
 0x29c   : > { %v2102_v35 = vpop.eup %2101 }
 0x29d   : > { %v2104_v37 = vpop.eup %2103  ;;  %v1050_v38 = vrot.slane %v2102_v35, %v2299_v8 }
 0x29e   : > { %v1054_v39 = vrot.slane %v2104_v37, %v2299_v8 }
 0x29f   : > { %1167 = vrot.lane.b32.xlu1 %v2535_v24, %s2163_s18  ;;  %v1055_v40 = vmul.f32 %v1050_v38, %v2505_v46  ;;  %v1057_v41 = vmul.f32 %v1050_v38, %v2503_v45  ;;  %773 = vrot.lane.b32.xlu0 %v2234_v0, %s2168_s25 }
 0x2a0   : > { %v1056_v42 = vmul.f32 %v1054_v39, %v2501_v44  ;;  %v1058_v43 = vmul.f32 %v1054_v39, %v2507_v50 }
 0x2a1   : > { %v1059_v51 = vpack.c.bf16 %v1057_v41, %v1055_v40 }
 0x2a2   : > { %v1060_v49 = vpack.c.bf16 %v1058_v43, %v1056_v42 }
 0x2a3   : > { %751 = vrot.lane.b32.xlu1 %v2234_v0, %s2169_s26  ;;  %795 = vrot.lane.b32.xlu0 %v2234_v0, %s2170_s10 }
 0x2a4   : > { %1068 = vmatprep.subr.bf16.mxu1 %v1060_v49 }
 0x2a5   : > { %1069 = vmatpush1.bf16.msra.mxu1 %v1059_v51 }
 0x2a7   : > { %753 = vrot.lane.b32.xlu1 %v2241_v1, %s2169_s26  ;;  %817 = vrot.lane.b32.xlu0 %v2234_v0, %s2171_s11 }
 0x2a8   : > { %2033 = vmatmul.mubr.msk.bf16.vlgmr.msra.gmra.mrb[8].mxu1 %vm986_vm6, %v2577_v4 }
 0x2a9   : > { %1228 = vmatprep.mubr.bf16.mxu1 %v2161_v2 }
 0x2ab   : > { %775 = vrot.lane.b32.xlu1 %v2241_v1, %s2168_s25  ;;  %839 = vrot.lane.b32.xlu0 %v2234_v0, %s2172_s13 }
 0x2af   : > { %797 = vrot.lane.b32.xlu1 %v2241_v1, %s2170_s10 }
 0x2b3   : > { %819 = vrot.lane.b32.xlu1 %v2241_v1, %s2171_s11 }
 0x2b7   : > { %841 = vrot.lane.b32.xlu1 %v2241_v1, %s2172_s13 }
 0x2f1   : > { %v1110_v52 = vpop.permute.xlu1 %1109  ;;  %v1118_v53 = vpop.permute.xlu0 %1117 }
 0x2f5   : > { %v1112_v58 = vpop.permute.xlu1 %1111  ;;  %v1126_v61 = vpop.permute.xlu0 %1125 }
 0x2f6   : > { %v1113_v63 = vsel %vm273_vm1, %v1110_v52, %v1112_v58  ;;  %v1114_v3 = vsel %vm273_vm1, %v1112_v58, %v1110_v52 }
 0x2f7   : > { %v1115_v1 = vmul.f32 %v1114_v3, %v2318_v16  ;;  %v1116_v20 = vmul.f32 %v1113_v63, %v2312_v14 }
 0x2f9   : > { %v1120_v5 = vpop.permute.xlu1 %1119  ;;  %v1134_v18 = vpop.permute.xlu0 %1133 }
 0x2fa   : > { %v1121_v0 = vsel %vm294_vm0, %v1118_v53, %v1120_v5  ;;  %v1122_v19 = vsel %vm294_vm0, %v1120_v5, %v1118_v53 }
 0x2fb   : > { %v1123_v21 = vmul.f32 %v1122_v19, %v2321_v17  ;;  %v1124_v22 = vmul.f32 %v1121_v0, %v2315_v15 }
 0x2fd   : > { %v1173_v23 = vpack.c.bf16 %v1123_v21, %v1115_v1  ;;  %v1128_v25 = vpop.permute.xlu1 %1127  ;;  %v1174_v26 = vpack.c.bf16 %v1124_v22, %v1116_v20  ;;  %v1142_v27 = vpop.permute.xlu0 %1141 }
 0x2fe   : > { %v1129_v28 = vsel %vm316_vm4, %v1126_v61, %v1128_v25  ;;  %v1130_v29 = vsel %vm316_vm4, %v1128_v25, %v1126_v61 }
 0x2ff   : > { %1196 = vmatprep.subr.bf16.mxu1 %v1174_v26  ;;  %v1131_v35 = vmul.f32 %v1130_v29, %v2355_v54  ;;  %v1132_v36 = vmul.f32 %v1129_v28, %v2358_v55 }
 0x300   : > { %1197 = vmatpush1.bf16.msra.mxu1 %v1173_v23 }
 0x301   : > { %v1136_v30 = vpop.permute.xlu1 %1135  ;;  %v1150_v40 = vpop.permute.xlu0 %1149 }
 0x302   : > { %v1137_v31 = vsel %vm338_vm5, %v1134_v18, %v1136_v30  ;;  %v1138_v34 = vsel %vm338_vm5, %v1136_v30, %v1134_v18 }
 0x303   : > { %v1139_v37 = vmul.f32 %v1138_v34, %v2362_v56  ;;  %v1140_v38 = vmul.f32 %v1137_v31, %v2365_v57 }
 0x305   : > { %v1175_v39 = vpack.c.bf16 %v1139_v37, %v1131_v35  ;;  %v1144_v41 = vpop.permute.xlu1 %1143  ;;  %v1176_v42 = vpack.c.bf16 %v1140_v38, %v1132_v36  ;;  %v1158_v63 = vpop.permute.xlu0 %1157  ;;  %v2645_v35 = vld [vmem:[%s3082_s1 + $0xc] sm:$0xf] }
 0x306   : > { %v1145_v43 = vsel %vm360_vm8, %v1142_v27, %v1144_v41  ;;  %v1146_v49 = vsel %vm360_vm8, %v1144_v41, %v1142_v27  ;;  %v2173_v41 = vmov 3  }
 0x307   : > { %v1147_v51 = vmul.f32 %v1145_v43, %v2396_v32  ;;  %v1148_v52 = vmul.f32 %v1146_v49, %v2399_v33  ;;  %1198 = vmatprep.subr.bf16.mxu1 %v1176_v42  ;;  %2093 = vset.pattern.permute.xlu1 %v2173_v41  ;;  %v2021_v49 = vld [vmem:[%s3085_s4 + $0x22] ss:$8 sm:$0x3] }
 0x308   : > { %1199 = vmatpush1.bf16.msra.mxu1 %v1175_v39 }
 0x309   : > { %v1177_v53 = vpack.c.bf16 %v1147_v51, %v2526_v6  ;;  %v1152_v58 = vpop.permute.xlu1 %1151  ;;  %v1178_v61 = vpack.c.bf16 %v1148_v52, %v2535_v24  ;;  %v1166_v21 = vpop.permute.xlu0 %1165  ;;  %v2022_v51 = vld [vmem:[%s3085_s4 + $0x23] ss:$8 sm:$0x3]  ;;  %v764_v52 = vrot.slane %v2021_v49, %v2299_v8 }
 0x30a   : > { %v1153_v3 = vsel %vm382_vm10, %v1150_v40, %v1152_v58  ;;  %v1154_v5 = vsel %vm382_vm10, %v1152_v58, %v1150_v40 }
 0x30b   : > { %1200 = vmatprep.subr.bf16.mxu1 %v1178_v61  ;;  %v1155_v6 = vmul.f32 %v1153_v3, %v2425_v10  ;;  %v1156_v24 = vmul.f32 %v1154_v5, %v2428_v11  ;;  %v786_v3 = vrot.slane %v2022_v51, %v2299_v8  ;;  %v790_v5 = vrot.slane %v2022_v51, %v2301_v9  ;;  %v2025_v51 = vld [vmem:[%s3085_s4 + $0x27] ss:$8 sm:$0x3] }
 0x30c   : > { %1201 = vmatpush1.bf16.msra.mxu1 %v1177_v53  ;;  %v768_v53 = vrot.slane %v2021_v49, %v2301_v9 }
 0x30d   : > { %v1160_v18 = vpop.permute.xlu1 %1159 }
 0x30e   : > { %v1161_v0 = vsel %vm404_vm11, %v1158_v63, %v1160_v18  ;;  %v1162_v19 = vsel %vm404_vm11, %v1160_v18, %v1158_v63 }
 0x30f   : > { %v1163_v1 = vmul.f32 %v1161_v0, %v2432_v12  ;;  %v1164_v20 = vmul.f32 %v1162_v19, %v2435_v13 }
 0x311   : > { %v1179_v22 = vpack.c.bf16 %v1163_v1, %v1155_v6  ;;  %v1168_v23 = vpop.permute.xlu1 %1167  ;;  %v1180_v25 = vpack.c.bf16 %v1164_v20, %v1156_v24  ;;  %v2023_v20 = vld [vmem:[%s3085_s4 + $0x24] ss:$8 sm:$0x3] }
 0x312   : > { %v1169_v26 = vsel %vm426_vm14, %v1166_v21, %v1168_v23  ;;  %v1170_v27 = vsel %vm426_vm14, %v1168_v23, %v1166_v21  ;;  %v2024_v23 = vld [vmem:[%s3085_s4 + $0x25] ss:$8 sm:$0x3] }
 0x313   : > { %v1171_v28 = vmul.f32 %v1169_v26, %v2466_v47  ;;  %v1172_v29 = vmul.f32 %v1170_v27, %v2469_v48  ;;  %1202 = vmatprep.subr.bf16.mxu1 %v1180_v25  ;;  %v2026_v25 = vld [vmem:[%s3085_s4 + $0x30] ss:$8 sm:$0x3]  ;;  %v2027_v26 = vld [vmem:[%s3085_s4 + $0x31] ss:$8 sm:$0x3]  ;;  %v830_v41 = vrot.slane %v2024_v23, %v2299_v8 }
 0x314   : > { %1203 = vmatpush1.bf16.msra.mxu1 %v1179_v22  ;;  %v886_v49 = vrot.slane %v2027_v26, %v2301_v9 }
 0x315   : > { %v1181_v30 = vpack.c.bf16 %v1171_v28, %v1171_v28  ;;  %v1182_v31 = vpack.c.bf16 %v1172_v29, %v1172_v29  ;;  %v752_v42 = vpop.permute.xlu1 %751  ;;  %v808_v29 = vrot.slane %v2023_v20, %v2299_v8 }
 0x317   : > { %2034 = vmatprep.subr.msk.bf16.mxu1 %vm463_vm2, %v1182_v31  ;;  %v1191_v34 = vsel %vm463_vm2, %v1181_v30, 0  ;;  %v812_v30 = vrot.slane %v2023_v20, %v2301_v9  ;;  %v856_v20 = vrot.slane %v2025_v51, %v2301_v9 }
 0x318   : > { %1205 = vmatpush1.bf16.msra.mxu1 %v1191_v34 }
 0x319   : > { %v754_v58 = vpop.permute.xlu1 %753 }
 0x31a   : > { %v2654_v40 = vpop.permute.xlu0 %1184  ;;  %v756_v61 = vsel %vm755_vm7, %v752_v42, %v754_v58  ;;  %v757_v63 = vsel %vm755_vm7, %v754_v58, %v752_v42  ;;  %v834_v42 = vrot.slane %v2024_v23, %v2301_v9 }
 0x31b   : > { %2035 = vmatmul.mubr.msk.bf16.vlgmr.msra.gmra.mrb[12].mxu1 %vm459_vm3, %v2645_v35  ;;  %v771_v0 = vmul.f32 %v764_v52, %v757_v63  ;;  %v772_v19 = vmul.f32 %v768_v53, %v756_v61 }
 0x31c   : > { %1471 = vmatprep.mubr.bf16.mxu1 %v2161_v2 }
 0x31d   : > { %v776_v6 = vpop.permute.xlu1 %775 }
 0x31e   : > { %v774_v43 = vpop.permute.xlu0 %773 }
 0x31f   : > { %v778_v24 = vsel %vm777_vm9, %v774_v43, %v776_v6  ;;  %v779_v1 = vsel %vm777_vm9, %v776_v6, %v774_v43  ;;  %v871_v43 = vrot.slane %v2026_v25, %v2301_v9  ;;  %v852_v6 = vrot.slane %v2025_v51, %v2299_v8 }
 0x320   : > { %v793_v21 = vmul.f32 %v786_v3, %v779_v1  ;;  %v794_v22 = vmul.f32 %v790_v5, %v778_v24  ;;  %v2028_v3 = vld [vmem:[%s3085_s4 + $0x32] ss:$8 sm:$0x3] }
 0x321   : > { %v798_v28 = vpop.permute.xlu1 %797  ;;  %v875_v23 = vmul.f32 %v871_v43, %v757_v63 }
 0x322   : > { %v796_v18 = vpop.permute.xlu0 %795  ;;  %v906_v27 = vpack.c.bf16 %v793_v21, %v771_v0  ;;  %v907_v34 = vpack.c.bf16 %v794_v22, %v772_v19  ;;  %v867_v22 = vrot.slane %v2026_v25, %v2299_v8 }
 0x324   : > { %929 = vmatprep.subr.bf16.mxu0 %v907_v34 }
 0x325   : > { %930 = vmatpush1.bf16.msra.mxu0 %v906_v27  ;;  %v820_v58 = vpop.permute.xlu1 %819  ;;  %v882_v27 = vrot.slane %v2027_v26, %v2299_v8  ;;  %v874_v26 = vmul.f32 %v867_v22, %v756_v61 }
 0x326   : > { %v818_v31 = vpop.permute.xlu0 %817 }
 0x327   : > { %v822_v5 = vsel %vm821_vm13, %v818_v31, %v820_v58 }
 0x328   : > { %v838_v19 = vmul.f32 %v834_v42, %v822_v5 }
 0x329   : > { %v842_v34 = vpop.permute.xlu1 %841 }
 0x32a   : > { %v840_v21 = vpop.permute.xlu0 %839 }
 0x32b   : > { %v844_v42 = vsel %vm843_vm15, %v840_v21, %v842_v34  ;;  %v845_v51 = vsel %vm843_vm15, %v842_v34, %v840_v21  ;;  %v258_v21 = vld [vmem:[%s3082_s1 + $0x8] sm:$0xf] }
 0x32c   : > { %v859_v25 = vmul.f32 %v852_v6, %v844_v42  ;;  %v860_v63 = vmul.f32 %v856_v20, %v845_v51 }
 0x37b   : > { %v2650_v36 = vpop.f32.mrb[8].mxu1 }
 0x37c   : > { %v2652_v37 = vpop.f32.mrb[9].mxu1 }
 0x37d   : > { %v1106_v38 = vpop.f32.mrb[10].mxu1 }
 0x37e   : > { %v1107_v39 = vpop.f32.mrb[11].mxu1  ;;  %v800_v38 = vsel %vm799_vm12, %v796_v18, %v798_v28 }
 0x37f   : > { %v801_v39 = vsel %vm799_vm12, %v798_v28, %v796_v18  ;;  %v816_v53 = vmul.f32 %v812_v30, %v800_v38  ;;  %v823_v18 = vsel %vm821_vm13, %v820_v58, %v818_v31  ;;  %v890_v28 = vmul.f32 %v886_v49, %v779_v1 }
 0x380   : > { %v815_v52 = vmul.f32 %v808_v29, %v801_v39  ;;  %v837_v0 = vmul.f32 %v830_v41, %v823_v18  ;;  %v897_v29 = vrot.slane %v2028_v3, %v2299_v8  ;;  %v901_v30 = vrot.slane %v2028_v3, %v2301_v9  ;;  %v2706_v3 = vld [vmem:[%s2231_s27] sm:$0xff] }
 0x381   : > { %v909_v41 = vpack.c.bf16 %v838_v19, %v816_v53  ;;  %v889_v1 = vmul.f32 %v882_v27, %v778_v24  ;;  %v913_v43 = vpack.c.bf16 %v890_v28, %v875_v23  ;;  %v2710_v53 = vld [vmem:[%s2231_s27 + $0x8] sm:$0xff]  ;;  %v2761_v28 = vld [vmem:[%s3084_s3] sm:$0xff] }
 0x382   : > { %v908_v31 = vpack.c.bf16 %v837_v0, %v815_v52  ;;  %v904_v49 = vmul.f32 %v897_v29, %v800_v38  ;;  %v905_v58 = vmul.f32 %v901_v30, %v801_v39  ;;  %v910_v52 = vpack.c.bf16 %v859_v25, %v2706_v3 }
 0x383   : > { %931 = vmatprep.subr.bf16.mxu0 %v909_v41  ;;  %v911_v5 = vpack.c.bf16 %v860_v63, %v2710_v53  ;;  %v912_v18 = vpack.c.bf16 %v889_v1, %v874_v26  ;;  %v2174_v29 = vmov 6   ;;  %v2175_v30 = vmov 2  }
 0x384   : > { %932 = vmatpush1.bf16.msra.mxu0 %v908_v31  ;;  %v914_v0 = vpack.c.bf16 %v904_v49, %v904_v49  ;;  %v915_v19 = vpack.c.bf16 %v905_v58, %v905_v58  ;;  %2092 = vset.pattern.permute.xlu0 %v2174_v29 }
 0x385   : > { %933 = vmatprep.subr.bf16.mxu0 %v911_v5 }
 0x386   : > { %v924_v61 = vsel %vm463_vm2, %v914_v0, 0 }
 0x388   : > { %934 = vmatpush1.bf16.msra.mxu0 %v910_v52 }
 0x389   : > { %935 = vmatprep.subr.bf16.mxu0 %v913_v43 }
 0x38c   : > { %936 = vmatpush1.bf16.msra.mxu0 %v912_v18 }
 0x38d   : > { %2029 = vmatprep.subr.msk.bf16.mxu0 %vm463_vm2, %v915_v19 }
 0x390   : > { %938 = vmatpush1.bf16.msra.mxu0 %v924_v61 }
 0x393   : > { %2030 = vmatmul.mubr.msk.bf16.vlgmr.msra.gmra.mrb[4].mxu0 %vm459_vm3, %v258_v21 }
 0x394   : > { %1358 = vmatprep.mubr.bf16.mxu0 %v2161_v2 }
 0x3ee   : > { %v1230_v24 = vpop.f32.mrb[12].mxu1 }
 0x3ef   : > { %v1231_v38 = vadd.f32 %v1230_v24, %v2654_v40  ;;  %v1232_v39 = vpop.f32.mrb[13].mxu1 }
 0x3f0   : > { %v1233_v6 = vadd.f32 %v1232_v39, %v2654_v40  ;;  %v1234_v20 = vpop.f32.mrb[14].mxu1 }
 0x3f1   : > { %v2720_v22 = vmax.f32 %v1231_v38, 0.0  ;;  %v1235_v23 = vpop.f32.mrb[15].mxu1 }
 0x3f2   : > { %v2723_v27 = vmax.f32 %v1233_v6, 0.0 }
 0x3f3   : > { %1239 = vrot.lane.b32.xlu0 %v2720_v22, %s2149_s29 }
 0x3f4   : > { %1241 = vrot.lane.b32.xlu1 %v2723_v27, %s2149_s29 }
 0x3f7   : > { %1247 = vrot.lane.b32.xlu0 %v2720_v22, %s2148_s28 }
 0x3f8   : > { %1249 = vrot.lane.b32.xlu1 %v2723_v27, %s2148_s28 }
 0x3fb   : > { %1255 = vrot.lane.b32.xlu0 %v2720_v22, %s2152_s8 }
 0x3fc   : > { %1257 = vrot.lane.b32.xlu1 %v2723_v27, %s2152_s8 }
 0x3ff   : > { %1263 = vrot.lane.b32.xlu0 %v2720_v22, %s2153_s9 }
 0x400   : > { %1265 = vrot.lane.b32.xlu1 %v2723_v27, %s2153_s9 }
 0x403   : > { %1271 = vrot.lane.b32.xlu0 %v2720_v22, %s2156_s12 }
 0x404   : > { %1273 = vrot.lane.b32.xlu1 %v2723_v27, %s2156_s12 }
 0x407   : > { %1279 = vrot.lane.b32.xlu0 %v2720_v22, %s2158_s14 }
 0x408   : > { %1281 = vrot.lane.b32.xlu1 %v2723_v27, %s2158_s14 }
 0x40b   : > { %1287 = vrot.lane.b32.xlu0 %v2720_v22, %s2159_s15 }
 0x40c   : > { %1289 = vrot.lane.b32.xlu1 %v2723_v27, %s2159_s15 }
 0x40f   : > { %1295 = vrot.lane.b32.xlu0 %v2720_v22, %s2163_s18 }
 0x410   : > { %1297 = vrot.lane.b32.xlu1 %v2723_v27, %s2163_s18 }
 0x413   : > { %1314 = vperm.xlu0 %2092, %v2761_v28  }
 0x414   : > { %1062 = vperm.xlu1 %2093, %v2761_v28  }
 0x418   : > { %2094 = vset.pattern.permute.xlu1 %v2175_v30 }
 0x419   : > { %917 = vperm.xlu1 %2094, %v2761_v28  }
 0x465   : > { %v1240_v31 = vpop.permute.xlu0 %1239 }
 0x466   : > { %v1242_v34 = vpop.permute.xlu1 %1241 }
 0x467   : > { %v1243_v41 = vsel %vm273_vm1, %v1240_v31, %v1242_v34  ;;  %v1244_v42 = vsel %vm273_vm1, %v1242_v34, %v1240_v31 }
 0x468   : > { %v1245_v1 = vmul.f32 %v1244_v42, %v2318_v16  ;;  %v1246_v43 = vmul.f32 %v1243_v41, %v2312_v14 }
 0x469   : > { %v1248_v51 = vpop.permute.xlu0 %1247 }
 0x46a   : > { %v1250_v25 = vpop.permute.xlu1 %1249 }
 0x46b   : > { %v1251_v63 = vsel %vm294_vm0, %v1248_v51, %v1250_v25  ;;  %v1252_v26 = vsel %vm294_vm0, %v1250_v25, %v1248_v51 }
 0x46c   : > { %v1253_v49 = vmul.f32 %v1252_v26, %v2321_v17  ;;  %v1254_v58 = vmul.f32 %v1251_v63, %v2315_v15 }
 0x46d   : > { %v1256_v52 = vpop.permute.xlu0 %1255 }
 0x46e   : > { %v1303_v5 = vpack.c.bf16 %v1253_v49, %v1245_v1  ;;  %v1258_v18 = vpop.permute.xlu1 %1257  ;;  %v1304_v0 = vpack.c.bf16 %v1254_v58, %v1246_v43 }
 0x46f   : > { %v1259_v19 = vsel %vm316_vm4, %v1256_v52, %v1258_v18  ;;  %v1260_v61 = vsel %vm316_vm4, %v1258_v18, %v1256_v52 }
 0x470   : > { %1326 = vmatprep.subr.bf16.mxu0 %v1304_v0  ;;  %v1261_v20 = vmul.f32 %v1260_v61, %v2355_v54  ;;  %v1262_v21 = vmul.f32 %v1259_v19, %v2358_v55 }
 0x471   : > { %1327 = vmatpush1.bf16.msra.mxu0 %v1303_v5  ;;  %v1264_v24 = vpop.permute.xlu0 %1263 }
 0x472   : > { %v1266_v38 = vpop.permute.xlu1 %1265 }
 0x473   : > { %v1267_v39 = vsel %vm338_vm5, %v1264_v24, %v1266_v38  ;;  %v1268_v6 = vsel %vm338_vm5, %v1266_v38, %v1264_v24 }
 0x474   : > { %v1269_v23 = vmul.f32 %v1268_v6, %v2362_v56  ;;  %v1270_v29 = vmul.f32 %v1267_v39, %v2365_v57 }
 0x475   : > { %v1272_v30 = vpop.permute.xlu0 %1271 }
 0x476   : > { %v1305_v31 = vpack.c.bf16 %v1269_v23, %v1261_v20  ;;  %v1274_v34 = vpop.permute.xlu1 %1273  ;;  %v1306_v41 = vpack.c.bf16 %v1270_v29, %v1262_v21 }
 0x477   : > { %v1275_v42 = vsel %vm360_vm8, %v1272_v30, %v1274_v34  ;;  %v1276_v51 = vsel %vm360_vm8, %v1274_v34, %v1272_v30 }
 0x478   : > { %v1277_v25 = vmul.f32 %v1275_v42, %v2396_v32  ;;  %v1278_v63 = vmul.f32 %v1276_v51, %v2399_v33  ;;  %1328 = vmatprep.subr.bf16.mxu0 %v1306_v41  ;;  %v2821_v42 = vld [vmem:[%s3082_s1 + $0x10] sm:$0xf]  ;;  %v2826_v51 = vpop.f32.mrb[4].mxu0 }
 0x479   : > { %1329 = vmatpush1.bf16.msra.mxu0 %v1305_v31  ;;  %v1280_v26 = vpop.permute.xlu0 %1279 }
 0x47a   : > { %v1307_v1 = vpack.c.bf16 %v1277_v25, %v2720_v22  ;;  %v1282_v43 = vpop.permute.xlu1 %1281  ;;  %v1308_v49 = vpack.c.bf16 %v1278_v63, %v2723_v27  ;;  %v965_v25 = vpop.f32.mrb[5].mxu0 }
 0x47b   : > { %v1283_v58 = vsel %vm382_vm10, %v1280_v26, %v1282_v43  ;;  %v1284_v52 = vsel %vm382_vm10, %v1282_v43, %v1280_v26  ;;  %v967_v63 = vpop.f32.mrb[6].mxu0 }
 0x47c   : > { %1330 = vmatprep.subr.bf16.mxu0 %v1308_v49  ;;  %v1285_v22 = vmul.f32 %v1283_v58, %v2425_v10  ;;  %v1286_v27 = vmul.f32 %v1284_v52, %v2428_v11  ;;  %v968_v26 = vpop.f32.mrb[7].mxu0 }
 0x47d   : > { %1331 = vmatpush1.bf16.msra.mxu0 %v1307_v1  ;;  %v1288_v5 = vpop.permute.xlu0 %1287 }
 0x47e   : > { %v1290_v18 = vpop.permute.xlu1 %1289 }
 0x47f   : > { %v1291_v0 = vsel %vm404_vm11, %v1288_v5, %v1290_v18  ;;  %v1292_v19 = vsel %vm404_vm11, %v1290_v18, %v1288_v5 }
 0x480   : > { %v1293_v61 = vmul.f32 %v1291_v0, %v2432_v12  ;;  %v1294_v24 = vmul.f32 %v1292_v19, %v2435_v13 }
 0x481   : > { %v1296_v38 = vpop.permute.xlu0 %1295 }
 0x482   : > { %v1309_v39 = vpack.c.bf16 %v1293_v61, %v1285_v22  ;;  %v1298_v6 = vpop.permute.xlu1 %1297  ;;  %v1310_v20 = vpack.c.bf16 %v1294_v24, %v1286_v27 }
 0x483   : > { %v1299_v21 = vsel %vm426_vm14, %v1296_v38, %v1298_v6  ;;  %v1300_v23 = vsel %vm426_vm14, %v1298_v6, %v1296_v38 }
 0x484   : > { %v1301_v29 = vmul.f32 %v1299_v21, %v2466_v47  ;;  %v1302_v30 = vmul.f32 %v1300_v23, %v2469_v48  ;;  %1332 = vmatprep.subr.bf16.mxu0 %v1310_v20 }
 0x485   : > { %1333 = vmatpush1.bf16.msra.mxu0 %v1309_v39 }
 0x486   : > { %v1311_v31 = vpack.c.bf16 %v1301_v29, %v1301_v29  ;;  %v1312_v34 = vpack.c.bf16 %v1302_v30, %v1302_v30 }
 0x488   : > { %2036 = vmatprep.subr.msk.bf16.mxu0 %vm463_vm2, %v1312_v34  ;;  %v1321_v41 = vsel %vm463_vm2, %v1311_v31, 0 }
 0x489   : > { %1335 = vmatpush1.bf16.msra.mxu0 %v1321_v41 }
 0x48c   : > { %2037 = vmatmul.mubr.msk.bf16.vlgmr.msra.gmra.mrb[8].mxu0 %vm459_vm3, %v2821_v42 }
 0x48d   : > { %1542 = vmatprep.mubr.bf16.mxu0 %v2161_v2 }
 0x492   : > { %v2828_v1 = vpop.permute.xlu0 %1314 }
 0x55f   : > { %v1360_v43 = vpop.f32.mrb[8].mxu0 }
 0x560   : > { %v1361_v49 = vadd.f32 %v1360_v43, %v2828_v1  ;;  %v1362_v58 = vpop.f32.mrb[9].mxu0 }
 0x561   : > { %v1363_v52 = vadd.f32 %v1362_v58, %v2828_v1  ;;  %v1364_v5 = vpop.f32.mrb[10].mxu0 }
 0x562   : > { %v1369_v18 = vrot.slane %v1361_v49, 1  ;;  %v1365_v0 = vpop.f32.mrb[11].mxu0 }
 0x563   : > { %v1370_v19 = vrot.slane %v1363_v52, 1 }
 0x564   : > { %v1373_v22 = vmax.f32 %v1361_v49, %v1369_v18 }
 0x565   : > { %v1374_v27 = vmax.f32 %v1363_v52, %v1370_v19 }
 0x566   : > { %v1375_v61 = vsub.f32 %v1361_v49, %v1373_v22  ;;  %v1383_v24 = vrot.slane %v1373_v22, 7 }
 0x567   : > { %v1376_v38 = vsub.f32 %v1363_v52, %v1374_v27  ;;  %v1384_v39 = vrot.slane %v1374_v27, 7 }
 0x568   : > { %v1387_v6 = vsub.f32 %v1361_v49, %v1383_v24  ;;  %v1377_v21 = vmul.f32 1.442695, %v1375_v61 }
 0x569   : > { %v1388_v20 = vsub.f32 %v1363_v52, %v1384_v39  ;;  %v1379_v29 = vmul.f32 1.442695, %v1376_v38  ;;  %v2834_v39 = vpop.permute.xlu1 %1062 }
 0x56a   : > { %v1389_v23 = vmul.f32 1.442695, %v1387_v6 }
 0x56b   : > { %v1391_v30 = vmul.f32 1.442695, %v1388_v20 }
 0x56c   : > { %2105 = vpow2.f32 %v1389_v23 }
 0x56d   : > { %2107 = vpow2.f32 %v1391_v30 }
 0x56e   : > { %2109 = vpow2.f32 %v1377_v21 }
 0x56f   : > { %2111 = vpow2.f32 %v1379_v29 }
 0x576   : > { %v2106_v31 = vpop.eup %2105 }
 0x577   : > { %v2108_v34 = vpop.eup %2107  ;;  %v1395_v41 = vrot.slane %v2106_v31, 1 }
 0x578   : > { %v2110_v63 = vpop.eup %2109  ;;  %v1396_v26 = vrot.slane %v2108_v34, 1 }
 0x579   : > { %v2112_v43 = vpop.eup %2111  ;;  %v1399_v58 = vadd.f32 %v2110_v63, %v1395_v41 }
 0x57a   : > { %v1400_v5 = vadd.f32 %v2112_v43, %v1396_v26 }
 0x57b   : > { %2113 = vrcp.f32 %v1399_v58 }
 0x57c   : > { %2115 = vrcp.f32 %v1400_v5 }
 0x585   : > { %v2114_v49 = vpop.eup %2113 }
 0x586   : > { %v2116_v52 = vpop.eup %2115  ;;  %v1403_v18 = vmul.f32 %v2114_v49, %v2110_v63  ;;  %v1407_v0 = vrot.slane %v2114_v49, 7  ;;  %v1105_v63 = vadd.f32 %v2652_v37, %v2834_v39 }
 0x587   : > { %v1404_v19 = vmul.f32 %v2116_v52, %v2112_v43  ;;  %v1408_v22 = vrot.slane %v2116_v52, 7 }
 0x588   : > { %v1411_v27 = vmul.f32 %v2106_v31, %v1407_v0  ;;  %v1416_v61 = vrot.slane %v1403_v18, %v2299_v8  ;;  %v1103_v31 = vadd.f32 %v2650_v36, %v2834_v39 }
 0x589   : > { %v1412_v24 = vmul.f32 %v2108_v34, %v1408_v22  ;;  %v1420_v38 = vrot.slane %v1404_v19, %v2299_v8  ;;  %v918_v34 = vpop.permute.xlu1 %917 }
 0x58a   : > { %v1426_v6 = vrot.slane %v1411_v27, %v2301_v9  ;;  %v1421_v21 = vmul.f32 %v1416_v61, %v2505_v46  ;;  %v2848_v58 = vadd.f32 %v965_v25, %v918_v34 }
 0x58b   : > { %v1430_v20 = vrot.slane %v1412_v24, %v2301_v9  ;;  %v1422_v29 = vmul.f32 %v1420_v38, %v2501_v44 }
 0x58c   : > { %v1431_v23 = vmul.f32 %v1426_v6, %v2503_v45  ;;  %v2853_v45 = vadd.f32 %v2826_v51, %v918_v34 }
 0x58d   : > { %v1432_v30 = vmul.f32 %v1430_v20, %v2507_v50 }
 0x58e   : > { %v1433_v41 = vadd.f32 %v1431_v23, %v1421_v21 }
 0x58f   : > { %v1434_v26 = vadd.f32 %v1432_v30, %v1422_v29 }
 0x590   : > { %v2846_v43 = vadd.f32 %v1433_v41, %v1103_v31 }
 0x591   : > { %v2850_v46 = vadd.f32 %v1434_v26, %v1105_v63 }
 0x592   : > { %v1437_v50 = vpack.c.bf16 %v2853_v45, %v2846_v43 }
 0x593   : > { %v1438_v44 = vpack.c.bf16 %v2848_v58, %v2850_v46 }
 0x595   : > { %1439 = vmatprep.subr.bf16.mxu1 %v1438_v44 }
 0x596   : > { %1440 = vmatpush1.bf16.msra.mxu1 %v1437_v50 }
 0x599   : > { %2038 = vmatmul.mubr.msk.bf16.vlgmr.msra.gmra.mrb[16].mxu1 %vm986_vm6, %v2516_v59 }
 0x59a   : > { %1663 = vmatprep.mubr.bf16.mxu1 %v2161_v2 }
 0x66c   : > { %v1473_v36 = vpop.f32.mrb[16].mxu1 }
 0x66d   : > { %v1474_v37 = vadd.f32 %v1473_v36, %v2521_v60  ;;  %v1475_v25 = vpop.f32.mrb[17].mxu1 }
 0x66e   : > { %v1476_v51 = vadd.f32 %v1475_v25, %v2521_v60  ;;  %v1477_v5 = vpop.f32.mrb[18].mxu1 }
 0x66f   : > { %v2864_v49 = vmax.f32 %v1474_v37, 0.0  ;;  %v1478_v52 = vadd.f32 %v1477_v5, %v2523_v62  ;;  %v1479_v18 = vpop.f32.mrb[19].mxu1 }
 0x670   : > { %v2867_v0 = vmax.f32 %v1476_v51, 0.0  ;;  %v1480_v19 = vadd.f32 %v1479_v18, %v2523_v62 }
 0x671   : > { %v1484_v22 = vmax.f32 %v1478_v52, 0.0  ;;  %1551 = vrot.lane.b32.xlu0 %v2864_v49, %s2149_s29 }
 0x672   : > { %v1485_v59 = vmax.f32 %v1480_v19, 0.0  ;;  %1553 = vrot.lane.b32.xlu1 %v2867_v0, %s2149_s29 }
 0x673   : > { %v1486_v27 = vsub.f32 0.0, %v1484_v22 }
 0x674   : > { %v1487_v60 = vsub.f32 0.0, %v1485_v59 }
 0x675   : > { %v1488_v61 = vmul.f32 1.442695, %v1486_v27  ;;  %1559 = vrot.lane.b32.xlu0 %v2864_v49, %s2148_s28 }
 0x676   : > { %v1490_v24 = vmul.f32 1.442695, %v1487_v60  ;;  %1561 = vrot.lane.b32.xlu1 %v2867_v0, %s2148_s28 }
 0x677   : > { %2117 = vpow2.f32 %v1488_v61 }
 0x678   : > { %2119 = vpow2.f32 %v1490_v24 }
 0x679   : > { %1567 = vrot.lane.b32.xlu0 %v2864_v49, %s2152_s8 }
 0x67a   : > { %1569 = vrot.lane.b32.xlu1 %v2867_v0, %s2152_s8 }
 0x67d   : > { %1575 = vrot.lane.b32.xlu0 %v2864_v49, %s2153_s9 }
 0x67e   : > { %1577 = vrot.lane.b32.xlu1 %v2867_v0, %s2153_s9 }
 0x681   : > { %v2118_v62 = vpop.eup %2117  ;;  %1583 = vrot.lane.b32.xlu0 %v2864_v49, %s2156_s12 }
 0x682   : > { %v2120_v38 = vpop.eup %2119  ;;  %v1492_v6 = vadd.f32 1.0, %v2118_v62  ;;  %1585 = vrot.lane.b32.xlu1 %v2867_v0, %s2156_s12 }
 0x683   : > { %v1493_v20 = vadd.f32 1.0, %v2120_v38 }
 0x684   : > { %2121 = vrcp.f32 %v1492_v6 }
 0x685   : > { %2123 = vrcp.f32 %v1493_v20  ;;  %1591 = vrot.lane.b32.xlu0 %v2864_v49, %s2158_s14 }
 0x686   : > { %1593 = vrot.lane.b32.xlu1 %v2867_v0, %s2158_s14 }
 0x689   : > { %1599 = vrot.lane.b32.xlu0 %v2864_v49, %s2159_s15 }
 0x68a   : > { %1601 = vrot.lane.b32.xlu1 %v2867_v0, %s2159_s15 }
 0x68d   : > { %1607 = vrot.lane.b32.xlu0 %v2864_v49, %s2163_s18 }
 0x68e   : > { %v2122_v21 = vpop.eup %2121  ;;  %1609 = vrot.lane.b32.xlu1 %v2867_v0, %s2163_s18 }
 0x68f   : > { %v2124_v23 = vpop.eup %2123  ;;  %v1499_v29 = vrot.slane %v2122_v21, %v2299_v8 }
 0x690   : > { %v1503_v30 = vrot.slane %v2124_v23, %v2299_v8 }
 0x691   : > { %v1504_v31 = vmul.f32 %v1499_v29, %v2846_v43  ;;  %v1506_v34 = vmul.f32 %v1499_v29, %v2853_v45 }
 0x692   : > { %v1505_v41 = vmul.f32 %v1503_v30, %v2850_v46  ;;  %v1507_v63 = vmul.f32 %v1503_v30, %v2848_v58 }
 0x693   : > { %v1508_v44 = vpack.c.bf16 %v1506_v34, %v1504_v31 }
 0x694   : > { %v1509_v26 = vpack.c.bf16 %v1507_v63, %v1505_v41 }
 0x696   : > { %1510 = vmatprep.subr.bf16.mxu0 %v1509_v26 }
 0x697   : > { %1511 = vmatpush1.bf16.msra.mxu0 %v1508_v44 }
 0x69a   : > { %2039 = vmatmul.mubr.msk.bf16.vlgmr.msra.gmra.mrb[12].mxu0 %vm986_vm6, %v2577_v4 }
 0x69b   : > { %1786 = vmatprep.mubr.bf16.mxu0 %v2161_v2 }
 0x6e3   : > { %v1552_v50 = vpop.permute.xlu0 %1551 }
 0x6e4   : > { %v1554_v36 = vpop.permute.xlu1 %1553 }
 0x6e5   : > { %v1555_v37 = vsel %vm273_vm1, %v1552_v50, %v1554_v36  ;;  %v1556_v25 = vsel %vm273_vm1, %v1554_v36, %v1552_v50 }
 0x6e6   : > { %v1557_v4 = vmul.f32 %v1556_v25, %v2318_v16  ;;  %v1558_v19 = vmul.f32 %v1555_v37, %v2312_v14 }
 0x6e7   : > { %v1560_v51 = vpop.permute.xlu0 %1559 }
 0x6e8   : > { %v1562_v5 = vpop.permute.xlu1 %1561 }
 0x6e9   : > { %v1563_v52 = vsel %vm294_vm0, %v1560_v51, %v1562_v5  ;;  %v1564_v18 = vsel %vm294_vm0, %v1562_v5, %v1560_v51 }
 0x6ea   : > { %v1565_v22 = vmul.f32 %v1564_v18, %v2321_v17  ;;  %v1566_v59 = vmul.f32 %v1563_v52, %v2315_v15 }
 0x6eb   : > { %v1568_v27 = vpop.permute.xlu0 %1567 }
 0x6ec   : > { %v1615_v60 = vpack.c.bf16 %v1565_v22, %v1557_v4  ;;  %v1570_v61 = vpop.permute.xlu1 %1569  ;;  %v1616_v24 = vpack.c.bf16 %v1566_v59, %v1558_v19 }
 0x6ed   : > { %v1571_v62 = vsel %vm316_vm4, %v1568_v27, %v1570_v61  ;;  %v1572_v38 = vsel %vm316_vm4, %v1570_v61, %v1568_v27 }
 0x6ee   : > { %1631 = vmatprep.subr.bf16.mxu1 %v1616_v24  ;;  %v1573_v29 = vmul.f32 %v1572_v38, %v2355_v54  ;;  %v1574_v30 = vmul.f32 %v1571_v62, %v2358_v55 }
 0x6ef   : > { %1632 = vmatpush1.bf16.msra.mxu1 %v1615_v60  ;;  %v1576_v6 = vpop.permute.xlu0 %1575 }
 0x6f0   : > { %v1578_v20 = vpop.permute.xlu1 %1577 }
 0x6f1   : > { %v1579_v21 = vsel %vm338_vm5, %v1576_v6, %v1578_v20  ;;  %v1580_v23 = vsel %vm338_vm5, %v1578_v20, %v1576_v6 }
 0x6f2   : > { %v1581_v31 = vmul.f32 %v1580_v23, %v2362_v56  ;;  %v1582_v34 = vmul.f32 %v1579_v21, %v2365_v57 }
 0x6f3   : > { %v1584_v41 = vpop.permute.xlu0 %1583 }
 0x6f4   : > { %v1617_v63 = vpack.c.bf16 %v1581_v31, %v1573_v29  ;;  %v1586_v26 = vpop.permute.xlu1 %1585  ;;  %v1618_v44 = vpack.c.bf16 %v1582_v34, %v1574_v30 }
 0x6f5   : > { %v1587_v50 = vsel %vm360_vm8, %v1584_v41, %v1586_v26  ;;  %v1588_v36 = vsel %vm360_vm8, %v1586_v26, %v1584_v41 }
 0x6f6   : > { %v1589_v37 = vmul.f32 %v1587_v50, %v2396_v32  ;;  %v1590_v25 = vmul.f32 %v1588_v36, %v2399_v33  ;;  %1633 = vmatprep.subr.bf16.mxu1 %v1618_v44 }
 0x6f7   : > { %1634 = vmatpush1.bf16.msra.mxu1 %v1617_v63  ;;  %v1592_v51 = vpop.permute.xlu0 %1591 }
 0x6f8   : > { %v1619_v5 = vpack.c.bf16 %v1589_v37, %v2864_v49  ;;  %v1594_v52 = vpop.permute.xlu1 %1593  ;;  %v1620_v18 = vpack.c.bf16 %v1590_v25, %v2867_v0 }
 0x6f9   : > { %v1595_v4 = vsel %vm382_vm10, %v1592_v51, %v1594_v52  ;;  %v1596_v19 = vsel %vm382_vm10, %v1594_v52, %v1592_v51 }
 0x6fa   : > { %1635 = vmatprep.subr.bf16.mxu1 %v1620_v18  ;;  %v1597_v49 = vmul.f32 %v1595_v4, %v2425_v10  ;;  %v1598_v0 = vmul.f32 %v1596_v19, %v2428_v11 }
 0x6fb   : > { %1636 = vmatpush1.bf16.msra.mxu1 %v1619_v5  ;;  %v1600_v22 = vpop.permute.xlu0 %1599 }
 0x6fc   : > { %v1602_v59 = vpop.permute.xlu1 %1601 }
 0x6fd   : > { %v1603_v27 = vsel %vm404_vm11, %v1600_v22, %v1602_v59  ;;  %v1604_v60 = vsel %vm404_vm11, %v1602_v59, %v1600_v22 }
 0x6fe   : > { %v1605_v61 = vmul.f32 %v1603_v27, %v2432_v12  ;;  %v1606_v24 = vmul.f32 %v1604_v60, %v2435_v13 }
 0x6ff   : > { %v1608_v62 = vpop.permute.xlu0 %1607 }
 0x700   : > { %v1621_v38 = vpack.c.bf16 %v1605_v61, %v1597_v49  ;;  %v1610_v6 = vpop.permute.xlu1 %1609  ;;  %v1622_v20 = vpack.c.bf16 %v1606_v24, %v1598_v0 }
 0x701   : > { %v1611_v21 = vsel %vm426_vm14, %v1608_v62, %v1610_v6  ;;  %v1612_v23 = vsel %vm426_vm14, %v1610_v6, %v1608_v62 }
 0x702   : > { %v1613_v29 = vmul.f32 %v1611_v21, %v2466_v47  ;;  %v1614_v30 = vmul.f32 %v1612_v23, %v2469_v48  ;;  %1637 = vmatprep.subr.bf16.mxu1 %v1622_v20 }
 0x703   : > { %1638 = vmatpush1.bf16.msra.mxu1 %v1621_v38 }
 0x704   : > { %v1623_v31 = vpack.c.bf16 %v1613_v29, %v1613_v29  ;;  %v1624_v34 = vpack.c.bf16 %v1614_v30, %v1614_v30 }
 0x706   : > { %2040 = vmatprep.subr.msk.bf16.mxu1 %vm463_vm2, %v1624_v34  ;;  %v1626_v41 = vsel %vm463_vm2, %v1623_v31, 0 }
 0x707   : > { %1640 = vmatpush1.bf16.msra.mxu1 %v1626_v41 }
 0x70a   : > { %2041 = vmatmul.mubr.msk.bf16.vlgmr.msra.gmra.mrb[20].mxu1 %vm459_vm3, %v2645_v35 }
 0x70b   : > { %1925 = vmatprep.mubr.bf16.mxu1 %v2161_v2 }
 0x76d   : > { %v2966_v63 = vpop.f32.mrb[12].mxu0 }
 0x76e   : > { %v2968_v26 = vpop.f32.mrb[13].mxu0 }
 0x76f   : > { %v1548_v44 = vpop.f32.mrb[14].mxu0 }
 0x770   : > { %v1549_v50 = vpop.f32.mrb[15].mxu0 }
 0x7dd   : > { %v1665_v36 = vpop.f32.mrb[20].mxu1 }
 0x7de   : > { %v1666_v37 = vadd.f32 %v1665_v36, %v2654_v40  ;;  %v1667_v25 = vpop.f32.mrb[21].mxu1 }
 0x7df   : > { %v1668_v51 = vadd.f32 %v1667_v25, %v2654_v40  ;;  %v1669_v5 = vpop.f32.mrb[22].mxu1 }
 0x7e0   : > { %v2972_v52 = vmax.f32 %v1666_v37, 0.0  ;;  %v1670_v18 = vpop.f32.mrb[23].mxu1 }
 0x7e1   : > { %v1673_v4 = vmax.f32 %v1668_v51, 0.0 }
 0x7e2   : > { %1674 = vrot.lane.b32.xlu0 %v2972_v52, %s2149_s29 }
 0x7e3   : > { %1676 = vrot.lane.b32.xlu1 %v1673_v4, %s2149_s29 }
 0x7e6   : > { %1682 = vrot.lane.b32.xlu0 %v2972_v52, %s2148_s28 }
 0x7e7   : > { %1684 = vrot.lane.b32.xlu1 %v1673_v4, %s2148_s28  ;;  %s1865_s28 = sld [smem:[#allocation2]] }
 0x7ea   : > { %1690 = vrot.lane.b32.xlu0 %v2972_v52, %s2152_s8 }
 0x7eb   : > { %1692 = vrot.lane.b32.xlu1 %v1673_v4, %s2152_s8 }
 0x7ed   : > { %s1869_s29 = ssub.f32 1.0, %s1865_s28 }
 0x7ee   : > { %1698 = vrot.lane.b32.xlu0 %v2972_v52, %s2153_s9 }
 0x7ef   : > { %1700 = vrot.lane.b32.xlu1 %v1673_v4, %s2153_s9 }
 0x7f2   : > { %1706 = vrot.lane.b32.xlu0 %v2972_v52, %s2156_s12 }
 0x7f3   : > { %1708 = vrot.lane.b32.xlu1 %v1673_v4, %s2156_s12 }
 0x7f6   : > { %1714 = vrot.lane.b32.xlu0 %v2972_v52, %s2158_s14 }
 0x7f7   : > { %1716 = vrot.lane.b32.xlu1 %v1673_v4, %s2158_s14 }
 0x7fa   : > { %1722 = vrot.lane.b32.xlu0 %v2972_v52, %s2159_s15 }
 0x7fb   : > { %1724 = vrot.lane.b32.xlu1 %v1673_v4, %s2159_s15  ;;  %s252_s15 = scalar_lea.vmem %s3087_s6, %s2048_s5 }
 0x7fe   : > { %1730 = vrot.lane.b32.xlu0 %v2972_v52, %s2163_s18 }
 0x7ff   : > { %1732 = vrot.lane.b32.xlu1 %v1673_v4, %s2163_s18 }
 0x854   : > { %v1675_v2 = vpop.permute.xlu0 %1674 }
 0x855   : > { %v1677_v35 = vpop.permute.xlu1 %1676 }
 0x856   : > { %v1678_v40 = vsel %vm273_vm1, %v1675_v2, %v1677_v35  ;;  %v1679_v19 = vsel %vm273_vm1, %v1677_v35, %v1675_v2 }
 0x857   : > { %v1680_v49 = vmul.f32 %v1679_v19, %v2318_v16  ;;  %v1681_v0 = vmul.f32 %v1678_v40, %v2312_v14 }
 0x858   : > { %v1683_v22 = vpop.permute.xlu0 %1682 }
 0x859   : > { %v1685_v59 = vpop.permute.xlu1 %1684 }
 0x85a   : > { %v1686_v27 = vsel %vm294_vm0, %v1683_v22, %v1685_v59  ;;  %v1687_v60 = vsel %vm294_vm0, %v1685_v59, %v1683_v22  ;;  %vm1883_vm0 = vcmask 64512  }
 0x85b   : > { %v1688_v61 = vmul.f32 %v1687_v60, %v2321_v17  ;;  %v1689_v24 = vmul.f32 %v1686_v27, %v2315_v15 }
 0x85c   : > { %v1691_v62 = vpop.permute.xlu0 %1690 }
 0x85d   : > { %v1738_v38 = vpack.c.bf16 %v1688_v61, %v1680_v49  ;;  %v1693_v6 = vpop.permute.xlu1 %1692  ;;  %v1739_v20 = vpack.c.bf16 %v1689_v24, %v1681_v0 }
 0x85e   : > { %v1694_v21 = vsel %vm316_vm4, %v1691_v62, %v1693_v6  ;;  %v1695_v23 = vsel %vm316_vm4, %v1693_v6, %v1691_v62  ;;  %v2176_v62 = vmov 7  }
 0x85f   : > { %1754 = vmatprep.subr.bf16.mxu0 %v1739_v20  ;;  %v1696_v17 = vmul.f32 %v1695_v23, %v2355_v54  ;;  %v1697_v30 = vmul.f32 %v1694_v21, %v2358_v55  ;;  %2095 = vset.pattern.permute.xlu0 %v2176_v62 }
 0x860   : > { %1755 = vmatpush1.bf16.msra.mxu0 %v1738_v38  ;;  %v1699_v29 = vpop.permute.xlu0 %1698  ;;  %1880 = vperm.xlu0 %2095, %v2761_v28  }
 0x861   : > { %v1701_v16 = vpop.permute.xlu1 %1700 }
 0x862   : > { %v1702_v14 = vsel %vm338_vm5, %v1699_v29, %v1701_v16  ;;  %v1703_v15 = vsel %vm338_vm5, %v1701_v16, %v1699_v29 }
 0x863   : > { %v1704_v31 = vmul.f32 %v1703_v15, %v2362_v56  ;;  %v1705_v34 = vmul.f32 %v1702_v14, %v2365_v57 }
 0x864   : > { %v1707_v41 = vpop.permute.xlu0 %1706 }
 0x865   : > { %v1740_v44 = vpack.c.bf16 %v1704_v31, %v1696_v17  ;;  %v1709_v50 = vpop.permute.xlu1 %1708  ;;  %v1741_v36 = vpack.c.bf16 %v1705_v34, %v1697_v30 }
 0x866   : > { %v1710_v37 = vsel %vm360_vm8, %v1707_v41, %v1709_v50  ;;  %v1711_v25 = vsel %vm360_vm8, %v1709_v50, %v1707_v41 }
 0x867   : > { %v1712_v51 = vmul.f32 %v1710_v37, %v2396_v32  ;;  %v1713_v54 = vmul.f32 %v1711_v25, %v2399_v33  ;;  %1756 = vmatprep.subr.bf16.mxu0 %v1741_v36 }
 0x868   : > { %1757 = vmatpush1.bf16.msra.mxu0 %v1740_v44  ;;  %v1715_v55 = vpop.permute.xlu0 %1714 }
 0x869   : > { %v1742_v56 = vpack.c.bf16 %v1712_v51, %v2972_v52  ;;  %v1717_v57 = vpop.permute.xlu1 %1716  ;;  %v1743_v5 = vpack.c.bf16 %v1713_v54, %v1673_v4 }
 0x86a   : > { %v1718_v18 = vsel %vm382_vm10, %v1715_v55, %v1717_v57  ;;  %v1719_v2 = vsel %vm382_vm10, %v1717_v57, %v1715_v55 }
 0x86b   : > { %1758 = vmatprep.subr.bf16.mxu0 %v1743_v5  ;;  %v1720_v52 = vmul.f32 %v1718_v18, %v2425_v10  ;;  %v1721_v4 = vmul.f32 %v1719_v2, %v2428_v11 }
 0x86c   : > { %1759 = vmatpush1.bf16.msra.mxu0 %v1742_v56  ;;  %v1723_v35 = vpop.permute.xlu0 %1722 }
 0x86d   : > { %v1725_v40 = vpop.permute.xlu1 %1724 }
 0x86e   : > { %v1726_v32 = vsel %vm404_vm11, %v1723_v35, %v1725_v40  ;;  %v1727_v33 = vsel %vm404_vm11, %v1725_v40, %v1723_v35 }
 0x86f   : > { %v1728_v19 = vmul.f32 %v1726_v32, %v2432_v12  ;;  %v1729_v22 = vmul.f32 %v1727_v33, %v2435_v13 }
 0x870   : > { %v1731_v59 = vpop.permute.xlu0 %1730 }
 0x871   : > { %v1744_v27 = vpack.c.bf16 %v1728_v19, %v1720_v52  ;;  %v1733_v60 = vpop.permute.xlu1 %1732  ;;  %v1745_v49 = vpack.c.bf16 %v1729_v22, %v1721_v4 }
 0x872   : > { %v1734_v0 = vsel %vm426_vm14, %v1731_v59, %v1733_v60  ;;  %v1735_v61 = vsel %vm426_vm14, %v1733_v60, %v1731_v59 }
 0x873   : > { %v1736_v24 = vmul.f32 %v1734_v0, %v2466_v47  ;;  %v1737_v10 = vmul.f32 %v1735_v61, %v2469_v48  ;;  %1760 = vmatprep.subr.bf16.mxu0 %v1745_v49  ;;  %v1870_v49 = vstv %s1869_s29  ;;  %v1545_v0 = vadd.f32 %v2966_v63, %v2834_v39 }
 0x874   : > { %1761 = vmatpush1.bf16.msra.mxu0 %v1744_v27 }
 0x875   : > { %v1746_v11 = vpack.c.bf16 %v1736_v24, %v1736_v24  ;;  %v1747_v12 = vpack.c.bf16 %v1737_v10, %v1737_v10  ;;  %v1866_v10 = vstv %s1865_s28 }
 0x877   : > { %2042 = vmatprep.subr.msk.bf16.mxu0 %vm463_vm2, %v1747_v12  ;;  %v1749_v13 = vsel %vm463_vm2, %v1746_v11, 0 }
 0x878   : > { %1763 = vmatpush1.bf16.msra.mxu0 %v1749_v13 }
 0x87b   : > { %2043 = vmatmul.mubr.msk.bf16.vlgmr.msra.gmra.mrb[16].mxu0 %vm459_vm3, %v2821_v42 }
 0x94e   : > { %v1788_v7 = vpop.f32.mrb[16].mxu0 }
 0x94f   : > { %v1789_v47 = vadd.f32 %v1788_v7, %v2828_v1  ;;  %v1790_v48 = vpop.f32.mrb[17].mxu0 }
 0x950   : > { %v1791_v38 = vadd.f32 %v1790_v48, %v2828_v1  ;;  %v1792_v6 = vpop.f32.mrb[18].mxu0 }
 0x951   : > { %v1797_v20 = vrot.slane %v1789_v47, 1  ;;  %v1793_v21 = vpop.f32.mrb[19].mxu0 }
 0x952   : > { %v1798_v23 = vrot.slane %v1791_v38, 1 }
 0x953   : > { %v1801_v29 = vmax.f32 %v1789_v47, %v1797_v20 }
 0x954   : > { %v1802_v16 = vmax.f32 %v1791_v38, %v1798_v23 }
 0x955   : > { %v1803_v14 = vsub.f32 %v1789_v47, %v1801_v29  ;;  %v1811_v15 = vrot.slane %v1801_v29, 7 }
 0x956   : > { %v1804_v17 = vsub.f32 %v1791_v38, %v1802_v16  ;;  %v1812_v42 = vrot.slane %v1802_v16, 7 }
 0x957   : > { %v1815_v30 = vsub.f32 %v1789_v47, %v1811_v15  ;;  %v1805_v34 = vmul.f32 1.442695, %v1803_v14 }
 0x958   : > { %v1816_v31 = vsub.f32 %v1791_v38, %v1812_v42  ;;  %v1807_v41 = vmul.f32 1.442695, %v1804_v17 }
 0x959   : > { %v1817_v28 = vmul.f32 1.442695, %v1815_v30 }
 0x95a   : > { %v1819_v44 = vmul.f32 1.442695, %v1816_v31 }
 0x95b   : > { %2125 = vpow2.f32 %v1817_v28 }
 0x95c   : > { %2127 = vpow2.f32 %v1819_v44 }
 0x95d   : > { %2129 = vpow2.f32 %v1805_v34 }
 0x95e   : > { %2131 = vpow2.f32 %v1807_v41 }
 0x965   : > { %v2126_v1 = vpop.eup %2125 }
 0x966   : > { %v2128_v50 = vpop.eup %2127  ;;  %v1823_v36 = vrot.slane %v2126_v1, 1 }
 0x967   : > { %v2130_v37 = vpop.eup %2129  ;;  %v1824_v25 = vrot.slane %v2128_v50, 1 }
 0x968   : > { %v2132_v51 = vpop.eup %2131  ;;  %v1827_v54 = vadd.f32 %v2130_v37, %v1823_v36 }
 0x969   : > { %v1828_v55 = vadd.f32 %v2132_v51, %v1824_v25 }
 0x96a   : > { %2133 = vrcp.f32 %v1827_v54 }
 0x96b   : > { %2135 = vrcp.f32 %v1828_v55 }
 0x974   : > { %v2134_v56 = vpop.eup %2133 }
 0x975   : > { %v2136_v57 = vpop.eup %2135  ;;  %v1831_v5 = vmul.f32 %v2134_v56, %v2130_v37  ;;  %v1835_v18 = vrot.slane %v2134_v56, 7 }
 0x976   : > { %v1832_v2 = vmul.f32 %v2136_v57, %v2132_v51  ;;  %v1836_v35 = vrot.slane %v2136_v57, 7 }
 0x977   : > { %v1839_v40 = vmul.f32 %v2126_v1, %v1835_v18  ;;  %v1844_v32 = vrot.slane %v1831_v5, %v2299_v8 }
 0x978   : > { %v1840_v33 = vmul.f32 %v2128_v50, %v1836_v35  ;;  %v1848_v52 = vrot.slane %v1832_v2, %v2299_v8  ;;  %v1547_v8 = vadd.f32 %v2968_v26, %v2834_v39 }
 0x979   : > { %v1854_v4 = vrot.slane %v1839_v40, %v2301_v9  ;;  %v1849_v22 = vmul.f32 %v1844_v32, %v2846_v43 }
 0x97a   : > { %v1858_v19 = vrot.slane %v1840_v33, %v2301_v9  ;;  %v1850_v27 = vmul.f32 %v1848_v52, %v2850_v46  ;;  %v1871_v9 = vmul.f32 %v2706_v3, %v1870_v49  ;;  %v262_v3 = vld [vmem:[%s3083_s2 + $0x4] sm:$0xf] }
 0x97b   : > { %v1859_v59 = vmul.f32 %v1854_v4, %v2853_v45  ;;  %v1872_v45 = vmul.f32 %v2710_v53, %v1870_v49  ;;  %v1881_v53 = vpop.permute.xlu0 %1880 }
 0x97c   : > { %v1860_v60 = vmul.f32 %v1858_v19, %v2848_v58 }
 0x97d   : > { %v1861_v61 = vadd.f32 %v1859_v59, %v1849_v22 }
 0x97e   : > { %v1862_v24 = vadd.f32 %v1860_v60, %v1850_v27 }
 0x97f   : > { %v1863_v11 = vadd.f32 %v1861_v61, %v1545_v0 }
 0x980   : > { %v1864_v43 = vadd.f32 %v1862_v24, %v1547_v8 }
 0x981   : > { %v1867_v12 = vmul.f32 %v1866_v10, %v1863_v11 }
 0x982   : > { %v1868_v46 = vmul.f32 %v1866_v10, %v1864_v43 }
 0x983   : > { %v1873_v13 = vadd.f32 %v1871_v9, %v1867_v12 }
 0x984   : > { %v1874_v58 = vadd.f32 %v1872_v45, %v1868_v46 }
 0x985   : > { %v1875_v62 = vmax.f32 %v1873_v13, 0.0 }
 0x986   : > { %v1876_v7 = vmax.f32 %v1874_v58, 0.0 }
 0x987   : > { %v1877_v63 = vpack.c.bf16 %v1875_v62, %v1875_v62 }
 0x988   : > { %v1878_v47 = vpack.c.bf16 %v1876_v7, %v1876_v7 }
 0x989   : > { %v1888_v48 = vsel %vm463_vm2, %v1877_v63, 0 }
 0x98a   : > { %2044 = vmatprep.subr.msk.bf16.mxu1 %vm463_vm2, %v1878_v47 }
 0x98b   : > { %1894 = vmatpush1.bf16.msra.mxu1 %v1888_v48 }
 0x98e   : > { %2045 = vmatmul.mubr.msk.bf16.vlgmr.msra.gmra.mrb[24].mxu1 %vm1883_vm0, %v262_v3 }
 0xa61   : > { %v1927_v39 = vpop.f32.mrb[24].mxu1 }
 0xa62   : > { %v1929_v26 = vpop.f32.mrb[25].mxu1  ;;  %v1928_v38 = vadd.f32 %v1927_v39, %v1881_v53 }
 0xa63   : > { %v1931_v6 = vpop.f32.mrb[26].mxu1  ;;  %v1930_v20 = vadd.f32 %v1929_v26, %v1881_v53 }
 0xa64   : > { %v1934_v21 = vmax.f32 %v1928_v38, 0.0  ;;  %v1932_v23 = vpop.f32.mrb[27].mxu1 }
 0xa65   : > { %v1935_v29 = vmax.f32 %v1930_v20, 0.0 }
 0xa66   : > { %1936 = vst [vmem:[%s252_s15] sm:$0xff] %v1934_v21 }
 0xa67   : > { %1937 = vst [vmem:[%s252_s15 + $0x8] sm:$0xff] %v1935_v29 }
 0xa68 PF: > { %s17_s23 = sadd.s32 1, %s2146_s23  }
 0xa69   : > { %p14_p4 = scmp.ge.s32.totalorder %s17_s23, 4  }
 0xa6b   :  { %16 = sbr.rel (!%p14_p4) target bundleno = 2 (0x2), region = 97 }

</bundles_post_ra>
